<compile_context>
chip_gen: v5e
topology: v5e:2x2
jax: 0.10.0
libtpu: 0.0.40
codegen_flags: <defaults>
</compile_context>

<pallas_src>
import jax
import jax.numpy as jnp
from jax.experimental import pallas as pl
from jax.experimental.pallas import tpu as pltpu

IN_DIM = 2          # (x, y) collocation coordinates
HIDDEN = 32         # hidden width of each sub-network
OUT_DIM = 1         # each sub-network emits a scalar field

H2 = 2 * HIDDEN     # fused hidden width (seg | pinn)
O2 = 2 * OUT_DIM    # fused output width: [K, u]

LANES = 128
TILE_N_MAX = 2048   # max batch rows per grid step (lane dim inside the kernel)
LANE_ALIGN = 128    # batch tile must be lane-aligned for full vregs in-kernel


def _round_up(v, m):
    return (v + m - 1) // m * m


def _cdiv(a, b):
    return (a + b - 1) // b


# Row offsets inside the single packed parameter array (all lane-0 aligned,
# all row starts multiples of 8).
R_W1 = 0
R_W2 = R_W1 + _round_up(H2, 8)
R_W3 = R_W2 + _round_up(H2, 8)
R_B1 = R_W3 + _round_up(O2, 8)
R_B2 = R_B1 + _round_up(H2, 8)
R_B3 = R_B2 + _round_up(H2, 8)
PACK_ROWS = R_B3 + _round_up(O2, 8)


def _combined_pinn_kernel(params_ref, x_ref, out_ref):
    # Static slices of the single packed parameter block (resident in VMEM).
    w1 = params_ref[R_W1:R_W1 + H2, 0:IN_DIM]   # [H2, IN_DIM]
    w2 = params_ref[R_W2:R_W2 + H2, 0:H2]       # [H2, H2]   (block-diagonal)
    w3 = params_ref[R_W3:R_W3 + O2, 0:H2]       # [O2, H2]   (block-diagonal)
    b1 = params_ref[R_B1:R_B1 + H2, 0:1]        # [H2, 1] -> broadcasts over lanes
    b2 = params_ref[R_B2:R_B2 + H2, 0:1]        # [H2, 1]
    b3 = params_ref[R_B3:R_B3 + O2, 0:1]        # [O2, 1]

    # Batch-major tile straight from HBM; tiny XLU transpose puts the batch
    # dimension into the lanes so every downstream vreg is fully populated.
    xt = x_ref[...].T                           # [IN_DIM, TILE]

    # Layer 1 on the VPU: contraction dim is only 2, so an MXU matmul would
    # waste >98% of the push; two broadcast FMAs per vreg are effectively free.
    h = jnp.tanh(w1[:, 0:1] * xt[0:1, :] + w1[:, 1:2] * xt[1:2, :] + b1)  # [H2, TILE]

    # Layers 2/3 on the MXU, feature-major (batch in lanes).
    h = jnp.tanh(jnp.dot(w2, h, preferred_element_type=jnp.float32) + b2)
    y = jnp.dot(w3, h, preferred_element_type=jnp.float32) + b3          # [O2, TILE]

    # Tiny transpose back to batch-major and store ([TILE, 2]); the handful of
    # masked stores per tile is far cheaper than a wrapper-side HBM pass.
    out_ref[...] = y.T.astype(out_ref.dtype)


def _block_diag(a, b):
    ra, ca = a.shape
    rb, cb = b.shape
    top = jnp.concatenate([a, jnp.zeros((ra, cb), a.dtype)], axis=1)
    bot = jnp.concatenate([jnp.zeros((rb, ca), b.dtype), b], axis=1)
    return jnp.concatenate([top, bot], axis=0)


def _pack_params(seg_params, pinn_params):
    """Fuse the two MLPs and pack everything into one lane-padded f32 slab."""
    sw1, sb1, sw2, sb2, sw3, sb3 = seg_params
    pw1, pb1, pw2, pb2, pw3, pb3 = pinn_params

    # Feature-major fused weights ([out_features, in_features]) so the kernel
    # computes W @ x^T with the batch dimension streaming down the lanes.
    # Output ordering: row 0 = K (segmentation), row 1 = u (pinn),
    # matching torch.cat([K, u], dim=-1) after the final transpose.
    w1f = jnp.concatenate([sw1, pw1], axis=1).T          # [H2, IN_DIM]
    w2f = _block_diag(sw2, pw2).T                        # [H2, H2]
    w3f = _block_diag(sw3, pw3).T                        # [O2, H2]
    b1f = jnp.concatenate([sb1, pb1], axis=1).T          # [H2, 1]
    b2f = jnp.concatenate([sb2, pb2], axis=1).T          # [H2, 1]
    b3f = jnp.concatenate([sb3, pb3], axis=1).T          # [O2, 1]

    packed = jnp.zeros((PACK_ROWS, LANES), jnp.float32)
    packed = packed.at[R_W1:R_W1 + H2, 0:IN_DIM].set(w1f)
    packed = packed.at[R_W2:R_W2 + H2, 0:H2].set(w2f)
    packed = packed.at[R_W3:R_W3 + O2, 0:H2].set(w3f)
    packed = packed.at[R_B1:R_B1 + H2, 0:1].set(b1f)
    packed = packed.at[R_B2:R_B2 + H2, 0:1].set(b2f)
    packed = packed.at[R_B3:R_B3 + O2, 0:1].set(b3f)
    return packed


def _choose_tiling(n):
    """Pick (tile, steps, n_pad): tile <= TILE_N_MAX, lane-aligned, and >=2
    grid steps once there is enough work (so v7x's two TCs both get tiles)."""
    n_al = _round_up(max(n, 1), LANE_ALIGN)
    if n_al >= 2 * LANE_ALIGN:
        steps = max(2, _cdiv(n_al, TILE_N_MAX))
    else:
        steps = 1
    tile = _round_up(_cdiv(n_al, steps), LANE_ALIGN)
    n_pad = steps * tile
    return tile, steps, n_pad


@jax.jit
def combined_pinn_forward(x, seg_params, pinn_params):
    """x: [N, IN_DIM] -> [N, 2]  (column 0 = K, column 1 = u)."""
    n = x.shape[0]
    packed = _pack_params(seg_params, pinn_params)

    tile, steps, n_pad = _choose_tiling(n)

    x_in = x.astype(jnp.float32)
    if n_pad != n:
        # Only pads when N is not tile-aligned; padded rows are sliced off below.
        x_in = jnp.pad(x_in, ((0, n_pad - n), (0, 0)))

    cost = pl.CostEstimate(
        flops=2 * n_pad * (H2 * IN_DIM + H2 * H2 + O2 * H2),
        transcendentals=2 * H2 * n_pad,
        bytes_accessed=n_pad * (IN_DIM + O2) * 4 + PACK_ROWS * LANES * 4,
    )

    out = pl.pallas_call(
        _combined_pinn_kernel,
        out_shape=jax.ShapeDtypeStruct((n_pad, O2), jnp.float32),
        grid_spec=pltpu.PrefetchScalarGridSpec(
            num_scalar_prefetch=0,
            grid=(steps,),
            in_specs=[
                # Packed params: single block, constant index -> DMA'd once,
                # stays resident across the whole grid.
                pl.BlockSpec((PACK_ROWS, LANES), lambda i: (0, 0)),
                # Batch-major x tile, pipelined over the grid.
                pl.BlockSpec((tile, IN_DIM), lambda i: (i, 0)),
            ],
            out_specs=pl.BlockSpec((tile, O2), lambda i: (i, 0)),
        ),
        compiler_params=pltpu.CompilerParams(
            dimension_semantics=("parallel",),   # shards tiles across TCs on v7x
        ),
        cost_estimate=cost,
    )(packed, x_in)

    return out if n_pad == n else out[:n]


# ---------------------------------------------------------------------------
# Parameter init (matches PyTorch nn.Linear defaults) and pure-JAX reference.
# ---------------------------------------------------------------------------
def _init_linear(key, fan_in, fan_out):
    kw, kb = jax.random.split(key)
    bound = 1.0 / jnp.sqrt(float(fan_in))
    w = jax.random.uniform(kw, (fan_in, fan_out), jnp.float32, -bound, bound)
    b = jax.random.uniform(kb, (1, fan_out), jnp.float32, -bound, bound)
    return w, b


def _init_mlp(key):
    k1, k2, k3 = jax.random.split(key, 3)
    w1, b1 = _init_linear(k1, IN_DIM, HIDDEN)
    w2, b2 = _init_linear(k2, HIDDEN, HIDDEN)
    w3, b3 = _init_linear(k3, HIDDEN, OUT_DIM)
    return (w1, b1, w2, b2, w3, b3)


def _reference(x, params):
    w1, b1, w2, b2, w3, b3 = params
    h = jnp.tanh(x @ w1 + b1)
    h = jnp.tanh(h @ w2 + b2)
    return h @ w3 + b3


if __name__ == "__main__":
    root = jax.random.PRNGKey(0)
    k_x, k_seg, k_pinn = jax.random.split(root, 3)

    N = 2048  # exercises a 2-step batch grid (tile = 1024)
    x = jax.random.normal(k_x, (N, IN_DIM), jnp.float32)
    seg_params = _init_mlp(k_seg)
    pinn_params = _init_mlp(k_pinn)

    out = combined_pinn_forward(x, seg_params, pinn_params)
    out = jax.block_until_ready(out)

    # Pure-JAX reference of the original (unfused) forward semantics.
    ref = jnp.concatenate(
        [_reference(x, seg_params), _reference(x, pinn_params)], axis=-1
    )
    assert out.shape == (N, O2), out.shape
    assert jnp.allclose(out, ref, atol=1e-4, rtol=1e-4), "mismatch vs reference"

    print("KERNEL_OK")
</pallas_src>

<mosaic_0001>
module attributes {stable_mosaic.version = 11 : i64} {
  func.func @_combined_pinn_kernel(%arg0: i32, %arg1: memref<272x128xf32, #tpu.memory_space<vmem>>, %arg2: memref<1024x2xf32, #tpu.memory_space<vmem>>, %arg3: memref<1024x2xf32, #tpu.memory_space<vmem>>) attributes {dimension_semantics = [#tpu.dimension_semantics<parallel>], iteration_bounds = array<i64: 2>, scalar_prefetch = 0 : i64, scratch_operands = 0 : i64, tpu.core_type = #tpu.core_type<tc>, window_params = [{pipeline_mode = #tpu.pipeline_mode<synchronous>, transform_indices = @transform_0, window_bounds = array<i64: 272, 128>}, {transform_indices = @transform_1, window_bounds = array<i64: 1024, 2>}, {transform_indices = @transform_2, window_bounds = array<i64: 1024, 2>}]} {
    %c0 = arith.constant 0 : index
    %c0_0 = arith.constant 0 : index
    %0 = vector.load %arg1[%c0, %c0_0] : memref<272x128xf32, #tpu.memory_space<vmem>>, vector<64x2xf32>
    %c64 = arith.constant 64 : index
    %c0_1 = arith.constant 0 : index
    %1 = vector.load %arg1[%c64, %c0_1] : memref<272x128xf32, #tpu.memory_space<vmem>>, vector<64x64xf32>
    %c128 = arith.constant 128 : index
    %c0_2 = arith.constant 0 : index
    %2 = vector.load %arg1[%c128, %c0_2] : memref<272x128xf32, #tpu.memory_space<vmem>>, vector<2x64xf32>
    %c136 = arith.constant 136 : index
    %c0_3 = arith.constant 0 : index
    %3 = vector.load %arg1[%c136, %c0_3] : memref<272x128xf32, #tpu.memory_space<vmem>>, vector<64x1xf32>
    %c200 = arith.constant 200 : index
    %c0_4 = arith.constant 0 : index
    %4 = vector.load %arg1[%c200, %c0_4] : memref<272x128xf32, #tpu.memory_space<vmem>>, vector<64x1xf32>
    %c264 = arith.constant 264 : index
    %c0_5 = arith.constant 0 : index
    %5 = vector.load %arg1[%c264, %c0_5] : memref<272x128xf32, #tpu.memory_space<vmem>>, vector<2x1xf32>
    %c0_6 = arith.constant 0 : index
    %c0_7 = arith.constant 0 : index
    %6 = vector.load %arg2[%c0_6, %c0_7] : memref<1024x2xf32, #tpu.memory_space<vmem>>, vector<1024x2xf32>
    %7 = tpu.transpose %6, [1, 0] : vector<1024x2xf32> -> vector<2x1024xf32>
    %8 = vector.extract_strided_slice %0 {offsets = [0, 0], sizes = [64, 1], strides = [1, 1]} : vector<64x2xf32> to vector<64x1xf32>
    %9 = vector.extract_strided_slice %7 {offsets = [0, 0], sizes = [1, 1024], strides = [1, 1]} : vector<2x1024xf32> to vector<1x1024xf32>
    %10 = vector.broadcast %8 : vector<64x1xf32> to vector<64x1024xf32>
    %11 = vector.broadcast %9 : vector<1x1024xf32> to vector<64x1024xf32>
    %12 = arith.mulf %10, %11 : vector<64x1024xf32>
    %13 = vector.extract_strided_slice %0 {offsets = [0, 1], sizes = [64, 1], strides = [1, 1]} : vector<64x2xf32> to vector<64x1xf32>
    %14 = vector.extract_strided_slice %7 {offsets = [1, 0], sizes = [1, 1024], strides = [1, 1]} : vector<2x1024xf32> to vector<1x1024xf32>
    %15 = vector.broadcast %13 : vector<64x1xf32> to vector<64x1024xf32>
    %16 = vector.broadcast %14 : vector<1x1024xf32> to vector<64x1024xf32>
    %17 = arith.mulf %15, %16 : vector<64x1024xf32>
    %18 = arith.addf %12, %17 : vector<64x1024xf32>
    %19 = vector.broadcast %3 : vector<64x1xf32> to vector<64x1024xf32>
    %20 = arith.addf %18, %19 : vector<64x1024xf32>
    %21 = math.tanh %20 : vector<64x1024xf32>
    %cst = arith.constant dense<0.000000e+00> : vector<64x1024xf32>
    %22 = tpu.matmul %1, %21, %cst {dimension_numbers = #tpu.dot_dimension_numbers<[1], [0], [0], [1], [0, 0, 1, 1], [], []>} : vector<64x64xf32>, vector<64x1024xf32>, vector<64x1024xf32> -> vector<64x1024xf32>
    %23 = vector.broadcast %4 : vector<64x1xf32> to vector<64x1024xf32>
    %24 = arith.addf %22, %23 : vector<64x1024xf32>
    %25 = math.tanh %24 : vector<64x1024xf32>
    %cst_8 = arith.constant dense<0.000000e+00> : vector<2x1024xf32>
    %26 = tpu.matmul %2, %25, %cst_8 {dimension_numbers = #tpu.dot_dimension_numbers<[1], [0], [0], [1], [0, 0, 1, 1], [], []>} : vector<2x64xf32>, vector<64x1024xf32>, vector<2x1024xf32> -> vector<2x1024xf32>
    %27 = vector.broadcast %5 : vector<2x1xf32> to vector<2x1024xf32>
    %28 = arith.addf %26, %27 : vector<2x1024xf32>
    %29 = tpu.transpose %28, [1, 0] : vector<2x1024xf32> -> vector<1024x2xf32>
    %c0_9 = arith.constant 0 : index
    %c0_10 = arith.constant 0 : index
    %30 = vector.load %arg3[%c0_9, %c0_10] : memref<1024x2xf32, #tpu.memory_space<vmem>>, vector<1024x2xf32>
    tpu.vector_store %arg3[%c0_9, %c0_10], %29 {strides = array<i32>} : memref<1024x2xf32, #tpu.memory_space<vmem>>, vector<1024x2xf32>,
    return
  }
  func.func @transform_0(%arg0: i32) -> (i32, i32) {
    %c0_i32 = arith.constant 0 : i32
    %c0_i32_0 = arith.constant 0 : i32
    %c0_i32_1 = arith.constant 0 : i32
    return %c0_i32, %c0_i32_0 : i32, i32
  }
  func.func @transform_1(%arg0: i32) -> (i32, i32) {
    %c0_i32 = arith.constant 0 : i32
    %c0_i32_0 = arith.constant 0 : i32
    return %arg0, %c0_i32 : i32, i32
  }
  func.func @transform_2(%arg0: i32) -> (i32, i32) {
    %c0_i32 = arith.constant 0 : i32
    %c0_i32_0 = arith.constant 0 : i32
    return %arg0, %c0_i32 : i32, i32
  }
}

</mosaic_0001>

<bundles_post_ra>
// kernel: combined_pinn_forward.1
= control target key start
LH: loop header
LB: loop body
LE: loop exit
PB: predicated region body
PF: predicated region fallthrough
CT: control target
= control target key end

     0   :  { %s2470_s9 = smov 0   ;;  %s3814_s0 = inlined_call_operand.vmem [shape: f32[272,128], index: 0, kind: input, shape index: {}]   ;;  %s3815_s1 = inlined_call_operand.vmem [shape: f32[2048,2], index: 1, kind: input, shape index: {}]   ;;  %s3816_s2 = inlined_call_operand.vmem [shape: f32[2048,2], index: 2, kind: output, shape index: {}]  }
   0x1 LB: > { %s2079_s10 = sadd.s32 4294967295, %s2451_s9   ;;  %p2083_p0 = scmp.ge.s32.totalorder %s2451_s9, 1  ;;  %s2451_s9 = sphi %s2470_s9, %s12_s9  }
   0x2   : > { %p113_p1 = scmp.lt.s32.totalorder %s2451_s9, 3 }
   0x4   : > { %p114_p2 = pnand %p2083_p0, %p113_p1 }
   0x6   : > { %117 = sbr.rel (%p114_p2) target bundleno = 1532 (0x5fc), region = 28 }
   0xb   : > { %s2084_s11 = sshll.u32 %s2079_s10, 7  ;;  %vm1053_vm0 = vcmask 523264   ;;  %vm1894_vm1 = vcmask 15360  }
   0xc   : > { %p136_p3 = scmp.lt.s32.totalorder %s2084_s11, 255 }
   0xe   : > { %s3866_s11 = smov (!%p136_p3, %s2084_s11), 255 }
   0xf   : > { %s2085_s12 = sshll.u32 %s3866_s11, 3 }
  0x10   : > { %s2486_s15 = scalar_lea.vmem %s3815_s1, %s2085_s12  ;;  %s3551_s8 = scalar_lea.vmem %s3816_s2, %s2085_s12 }
  0x11   : > { %v213_v0 = vld [vmem:[%s2486_s15 + $0x100] sm:$0xff]  ;;  %v214_v3 = vld [vmem:[%s2486_s15 + $0x108] sm:$0xff]  ;;  %v215_v6 = vld [vmem:[%s2486_s15 + $0x110] sm:$0xff] }
  0x12   : > { %v197_v1 = vld [vmem:[%s2486_s15 + $0x80] sm:$0xff]  ;;  %373 = vxpose.xlu2.b32.start [1/16] (narrow) %v213_v0, 8  ;;  %v198_v4 = vld [vmem:[%s2486_s15 + $0x88] sm:$0xff]  ;;  %v199_v7 = vld [vmem:[%s2486_s15 + $0x90] sm:$0xff] }
  0x13   : > { %v181_v2 = vld [vmem:[%s2486_s15] sm:$0xff]  ;;  %341 = vxpose.xlu1.b32.start [1/16] (narrow) %v197_v1, 8  ;;  %v182_v5 = vld [vmem:[%s2486_s15 + $0x8] sm:$0xff]  ;;  %v183_v8 = vld [vmem:[%s2486_s15 + $0x10] sm:$0xff] }
  0x14   : > { %309 = vxpose.xlu0.b32.start [1/16] (narrow) %v181_v2, 8  ;;  %v216_v9 = vld [vmem:[%s2486_s15 + $0x118] sm:$0xff]  ;;  %v217_v12 = vld [vmem:[%s2486_s15 + $0x120] sm:$0xff]  ;;  %v218_v15 = vld [vmem:[%s2486_s15 + $0x128] sm:$0xff] }
  0x15   : > { %v200_v10 = vld [vmem:[%s2486_s15 + $0x98] sm:$0xff]  ;;  %v201_v13 = vld [vmem:[%s2486_s15 + $0xa0] sm:$0xff]  ;;  %v202_v16 = vld [vmem:[%s2486_s15 + $0xa8] sm:$0xff] }
  0x16   : > { %v184_v11 = vld [vmem:[%s2486_s15 + $0x18] sm:$0xff]  ;;  %v185_v14 = vld [vmem:[%s2486_s15 + $0x20] sm:$0xff]  ;;  %v186_v17 = vld [vmem:[%s2486_s15 + $0x28] sm:$0xff] }
  0x17   : > { %v219_v18 = vld [vmem:[%s2486_s15 + $0x130] sm:$0xff]  ;;  %v220_v21 = vld [vmem:[%s2486_s15 + $0x138] sm:$0xff]  ;;  %v221_v24 = vld [vmem:[%s2486_s15 + $0x140] sm:$0xff] }
  0x18   : > { %v203_v19 = vld [vmem:[%s2486_s15 + $0xb0] sm:$0xff]  ;;  %v204_v22 = vld [vmem:[%s2486_s15 + $0xb8] sm:$0xff]  ;;  %v205_v25 = vld [vmem:[%s2486_s15 + $0xc0] sm:$0xff] }
  0x19   : > { %v187_v20 = vld [vmem:[%s2486_s15 + $0x30] sm:$0xff]  ;;  %v188_v23 = vld [vmem:[%s2486_s15 + $0x38] sm:$0xff]  ;;  %v189_v26 = vld [vmem:[%s2486_s15 + $0x40] sm:$0xff] }
  0x1a   : > { %374 = vxpose.xlu2.b32.cont [2/16] (narrow) %v214_v3, 8  ;;  %v222_v27 = vld [vmem:[%s2486_s15 + $0x148] sm:$0xff]  ;;  %v223_v30 = vld [vmem:[%s2486_s15 + $0x150] sm:$0xff]  ;;  %v224_v33 = vld [vmem:[%s2486_s15 + $0x158] sm:$0xff] }
  0x1b   : > { %342 = vxpose.xlu1.b32.cont [2/16] (narrow) %v198_v4, 8  ;;  %v206_v28 = vld [vmem:[%s2486_s15 + $0xc8] sm:$0xff]  ;;  %v207_v31 = vld [vmem:[%s2486_s15 + $0xd0] sm:$0xff]  ;;  %v208_v34 = vld [vmem:[%s2486_s15 + $0xd8] sm:$0xff] }
  0x1c   : > { %310 = vxpose.xlu0.b32.cont [2/16] (narrow) %v182_v5, 8  ;;  %v190_v29 = vld [vmem:[%s2486_s15 + $0x48] sm:$0xff]  ;;  %v191_v32 = vld [vmem:[%s2486_s15 + $0x50] sm:$0xff]  ;;  %v192_v35 = vld [vmem:[%s2486_s15 + $0x58] sm:$0xff] }
  0x1d   : > { %v225_v36 = vld [vmem:[%s2486_s15 + $0x160] sm:$0xff]  ;;  %v226_v39 = vld [vmem:[%s2486_s15 + $0x168] sm:$0xff]  ;;  %v227_v42 = vld [vmem:[%s2486_s15 + $0x170] sm:$0xff] }
  0x1e   : > { %v209_v37 = vld [vmem:[%s2486_s15 + $0xe0] sm:$0xff]  ;;  %v210_v40 = vld [vmem:[%s2486_s15 + $0xe8] sm:$0xff]  ;;  %v211_v43 = vld [vmem:[%s2486_s15 + $0xf0] sm:$0xff] }
  0x1f   : > { %v193_v38 = vld [vmem:[%s2486_s15 + $0x60] sm:$0xff]  ;;  %v194_v41 = vld [vmem:[%s2486_s15 + $0x68] sm:$0xff]  ;;  %v195_v44 = vld [vmem:[%s2486_s15 + $0x70] sm:$0xff] }
  0x20   : > { %v228_v45 = vld [vmem:[%s2486_s15 + $0x178] sm:$0xff]  ;;  %v261_v48 = vld [vmem:[%s2486_s15 + $0x280] sm:$0xff]  ;;  %v262_v51 = vld [vmem:[%s2486_s15 + $0x288] sm:$0xff] }
  0x21   : > { %v212_v46 = vld [vmem:[%s2486_s15 + $0xf8] sm:$0xff]  ;;  %v245_v49 = vld [vmem:[%s2486_s15 + $0x200] sm:$0xff]  ;;  %v246_v52 = vld [vmem:[%s2486_s15 + $0x208] sm:$0xff] }
  0x22   : > { %375 = vxpose.xlu2.b32.cont [3/16] (narrow) %v215_v6, 8  ;;  %v196_v47 = vld [vmem:[%s2486_s15 + $0x78] sm:$0xff]  ;;  %v229_v50 = vld [vmem:[%s2486_s15 + $0x180] sm:$0xff]  ;;  %v230_v53 = vld [vmem:[%s2486_s15 + $0x188] sm:$0xff] }
  0x23   : > { %343 = vxpose.xlu1.b32.cont [3/16] (narrow) %v199_v7, 8  ;;  %v263_v54 = vld [vmem:[%s2486_s15 + $0x290] sm:$0xff]  ;;  %v264_v57 = vld [vmem:[%s2486_s15 + $0x298] sm:$0xff]  ;;  %v265_v60 = vld [vmem:[%s2486_s15 + $0x2a0] sm:$0xff] }
  0x24   : > { %311 = vxpose.xlu0.b32.cont [3/16] (narrow) %v183_v8, 8  ;;  %v247_v55 = vld [vmem:[%s2486_s15 + $0x210] sm:$0xff]  ;;  %v248_v58 = vld [vmem:[%s2486_s15 + $0x218] sm:$0xff]  ;;  %v249_v61 = vld [vmem:[%s2486_s15 + $0x220] sm:$0xff] }
  0x25   : > { %v231_v56 = vld [vmem:[%s2486_s15 + $0x190] sm:$0xff]  ;;  %v232_v59 = vld [vmem:[%s2486_s15 + $0x198] sm:$0xff]  ;;  %v233_v62 = vld [vmem:[%s2486_s15 + $0x1a0] sm:$0xff] }
  0x26   : > { %v266_v63 = vld [vmem:[%s2486_s15 + $0x2a8] sm:$0xff]  ;;  %v267_v2 = vld [vmem:[%s2486_s15 + $0x2b0] sm:$0xff]  ;;  %v268_v5 = vld [vmem:[%s2486_s15 + $0x2b8] sm:$0xff] }
  0x27   : > { %v250_v0 = vld [vmem:[%s2486_s15 + $0x228] sm:$0xff]  ;;  %v251_v3 = vld [vmem:[%s2486_s15 + $0x230] sm:$0xff]  ;;  %v252_v6 = vld [vmem:[%s2486_s15 + $0x238] sm:$0xff] }
  0x28   : > { %v234_v1 = vld [vmem:[%s2486_s15 + $0x1a8] sm:$0xff]  ;;  %v235_v4 = vld [vmem:[%s2486_s15 + $0x1b0] sm:$0xff]  ;;  %v236_v7 = vld [vmem:[%s2486_s15 + $0x1b8] sm:$0xff] }
  0x29   : > { %v269_v8 = vld [vmem:[%s2486_s15 + $0x2c0] sm:$0xff] }
  0x2a   : > { %376 = vxpose.xlu2.b32.cont [4/16] (narrow) %v216_v9, 8  ;;  %v253_v9 = vld [vmem:[%s2486_s15 + $0x240] sm:$0xff] }
  0x2b   : > { %344 = vxpose.xlu1.b32.cont [4/16] (narrow) %v200_v10, 8  ;;  %v237_v10 = vld [vmem:[%s2486_s15 + $0x1c0] sm:$0xff] }
  0x2c   : > { %312 = vxpose.xlu0.b32.cont [4/16] (narrow) %v184_v11, 8  ;;  %v270_v11 = vld [vmem:[%s2486_s15 + $0x2c8] sm:$0xff] }
  0x32   : > { %377 = vxpose.xlu2.b32.cont [5/16] (narrow) %v217_v12, 8  ;;  %v254_v12 = vld [vmem:[%s2486_s15 + $0x248] sm:$0xff] }
  0x33   : > { %345 = vxpose.xlu1.b32.cont [5/16] (narrow) %v201_v13, 8  ;;  %v238_v13 = vld [vmem:[%s2486_s15 + $0x1c8] sm:$0xff] }
  0x34   : > { %313 = vxpose.xlu0.b32.cont [5/16] (narrow) %v185_v14, 8  ;;  %v271_v14 = vld [vmem:[%s2486_s15 + $0x2d0] sm:$0xff] }
  0x3a   : > { %378 = vxpose.xlu2.b32.cont [6/16] (narrow) %v218_v15, 8  ;;  %v255_v15 = vld [vmem:[%s2486_s15 + $0x250] sm:$0xff] }
  0x3b   : > { %346 = vxpose.xlu1.b32.cont [6/16] (narrow) %v202_v16, 8  ;;  %v239_v16 = vld [vmem:[%s2486_s15 + $0x1d0] sm:$0xff] }
  0x3c   : > { %314 = vxpose.xlu0.b32.cont [6/16] (narrow) %v186_v17, 8  ;;  %v272_v17 = vld [vmem:[%s2486_s15 + $0x2d8] sm:$0xff] }
  0x42   : > { %379 = vxpose.xlu2.b32.cont [7/16] (narrow) %v219_v18, 8  ;;  %v256_v18 = vld [vmem:[%s2486_s15 + $0x258] sm:$0xff] }
  0x43   : > { %347 = vxpose.xlu1.b32.cont [7/16] (narrow) %v203_v19, 8  ;;  %v240_v19 = vld [vmem:[%s2486_s15 + $0x1d8] sm:$0xff] }
  0x44   : > { %315 = vxpose.xlu0.b32.cont [7/16] (narrow) %v187_v20, 8  ;;  %v273_v20 = vld [vmem:[%s2486_s15 + $0x2e0] sm:$0xff] }
  0x4a   : > { %380 = vxpose.xlu2.b32.cont [8/16] (narrow) %v220_v21, 8  ;;  %v257_v21 = vld [vmem:[%s2486_s15 + $0x260] sm:$0xff] }
  0x4b   : > { %348 = vxpose.xlu1.b32.cont [8/16] (narrow) %v204_v22, 8  ;;  %v241_v22 = vld [vmem:[%s2486_s15 + $0x1e0] sm:$0xff] }
  0x4c   : > { %316 = vxpose.xlu0.b32.cont [8/16] (narrow) %v188_v23, 8  ;;  %v274_v23 = vld [vmem:[%s2486_s15 + $0x2e8] sm:$0xff] }
  0x52   : > { %381 = vxpose.xlu2.b32.cont [9/16] (narrow) %v221_v24, 8  ;;  %v258_v24 = vld [vmem:[%s2486_s15 + $0x268] sm:$0xff] }
  0x53   : > { %349 = vxpose.xlu1.b32.cont [9/16] (narrow) %v205_v25, 8  ;;  %v242_v25 = vld [vmem:[%s2486_s15 + $0x1e8] sm:$0xff] }
  0x54   : > { %317 = vxpose.xlu0.b32.cont [9/16] (narrow) %v189_v26, 8  ;;  %v275_v26 = vld [vmem:[%s2486_s15 + $0x2f0] sm:$0xff] }
  0x5a   : > { %382 = vxpose.xlu2.b32.cont [10/16] (narrow) %v222_v27, 8  ;;  %v259_v27 = vld [vmem:[%s2486_s15 + $0x270] sm:$0xff] }
  0x5b   : > { %350 = vxpose.xlu1.b32.cont [10/16] (narrow) %v206_v28, 8  ;;  %v243_v28 = vld [vmem:[%s2486_s15 + $0x1f0] sm:$0xff] }
  0x5c   : > { %318 = vxpose.xlu0.b32.cont [10/16] (narrow) %v190_v29, 8  ;;  %v276_v29 = vld [vmem:[%s2486_s15 + $0x2f8] sm:$0xff] }
  0x62   : > { %383 = vxpose.xlu2.b32.cont [11/16] (narrow) %v223_v30, 8  ;;  %v260_v30 = vld [vmem:[%s2486_s15 + $0x278] sm:$0xff] }
  0x63   : > { %351 = vxpose.xlu1.b32.cont [11/16] (narrow) %v207_v31, 8  ;;  %v244_v31 = vld [vmem:[%s2486_s15 + $0x1f8] sm:$0xff] }
  0x64   : > { %319 = vxpose.xlu0.b32.cont [11/16] (narrow) %v191_v32, 8  ;;  %v293_v32 = vld [vmem:[%s2486_s15 + $0x380] sm:$0xff] }
  0x6a   : > { %384 = vxpose.xlu2.b32.cont [12/16] (narrow) %v224_v33, 8  ;;  %v277_v33 = vld [vmem:[%s2486_s15 + $0x300] sm:$0xff] }
  0x6b   : > { %352 = vxpose.xlu1.b32.cont [12/16] (narrow) %v208_v34, 8  ;;  %v294_v34 = vld [vmem:[%s2486_s15 + $0x388] sm:$0xff] }
  0x6c   : > { %320 = vxpose.xlu0.b32.cont [12/16] (narrow) %v192_v35, 8  ;;  %v278_v35 = vld [vmem:[%s2486_s15 + $0x308] sm:$0xff] }
  0x72   : > { %385 = vxpose.xlu2.b32.cont [13/16] (narrow) %v225_v36, 8  ;;  %v295_v36 = vld [vmem:[%s2486_s15 + $0x390] sm:$0xff] }
  0x73   : > { %353 = vxpose.xlu1.b32.cont [13/16] (narrow) %v209_v37, 8  ;;  %v279_v37 = vld [vmem:[%s2486_s15 + $0x310] sm:$0xff] }
  0x74   : > { %321 = vxpose.xlu0.b32.cont [13/16] (narrow) %v193_v38, 8  ;;  %v296_v38 = vld [vmem:[%s2486_s15 + $0x398] sm:$0xff] }
  0x7a   : > { %386 = vxpose.xlu2.b32.cont [14/16] (narrow) %v226_v39, 8  ;;  %v280_v39 = vld [vmem:[%s2486_s15 + $0x318] sm:$0xff] }
  0x7b   : > { %354 = vxpose.xlu1.b32.cont [14/16] (narrow) %v210_v40, 8  ;;  %v297_v40 = vld [vmem:[%s2486_s15 + $0x3a0] sm:$0xff] }
  0x7c   : > { %322 = vxpose.xlu0.b32.cont [14/16] (narrow) %v194_v41, 8  ;;  %v281_v41 = vld [vmem:[%s2486_s15 + $0x320] sm:$0xff] }
  0x82   : > { %387 = vxpose.xlu2.b32.cont [15/16] (narrow) %v227_v42, 8  ;;  %v298_v42 = vld [vmem:[%s2486_s15 + $0x3a8] sm:$0xff] }
  0x83   : > { %355 = vxpose.xlu1.b32.cont [15/16] (narrow) %v211_v43, 8  ;;  %v282_v43 = vld [vmem:[%s2486_s15 + $0x328] sm:$0xff] }
  0x84   : > { %323 = vxpose.xlu0.b32.cont [15/16] (narrow) %v195_v44, 8  ;;  %v299_v44 = vld [vmem:[%s2486_s15 + $0x3b0] sm:$0xff] }
  0x8a   : > { %388 = vxpose.xlu2.b32.end [16/16] (narrow) %v228_v45, 8  ;;  %v283_v45 = vld [vmem:[%s2486_s15 + $0x330] sm:$0xff] }
  0x8b   : > { %356 = vxpose.xlu1.b32.end [16/16] (narrow) %v212_v46, 8  ;;  %v300_v46 = vld [vmem:[%s2486_s15 + $0x3b8] sm:$0xff] }
  0x8c   : > { %324 = vxpose.xlu0.b32.end [16/16] (narrow) %v196_v47, 8  ;;  %v284_v47 = vld [vmem:[%s2486_s15 + $0x338] sm:$0xff] }
  0x92   : > { %469 = vxpose.xlu2.b32.start [1/16] (narrow) %v261_v48, 8  ;;  %v301_v48 = vld [vmem:[%s2486_s15 + $0x3c0] sm:$0xff] }
  0x93   : > { %437 = vxpose.xlu1.b32.start [1/16] (narrow) %v245_v49, 8  ;;  %v285_v49 = vld [vmem:[%s2486_s15 + $0x340] sm:$0xff] }
  0x94   : > { %405 = vxpose.xlu0.b32.start [1/16] (narrow) %v229_v50, 8  ;;  %v302_v50 = vld [vmem:[%s2486_s15 + $0x3c8] sm:$0xff] }
  0x9a   : > { %470 = vxpose.xlu2.b32.cont [2/16] (narrow) %v262_v51, 8  ;;  %v286_v51 = vld [vmem:[%s2486_s15 + $0x348] sm:$0xff] }
  0x9b   : > { %438 = vxpose.xlu1.b32.cont [2/16] (narrow) %v246_v52, 8  ;;  %v303_v52 = vld [vmem:[%s2486_s15 + $0x3d0] sm:$0xff] }
  0x9c   : > { %406 = vxpose.xlu0.b32.cont [2/16] (narrow) %v230_v53, 8  ;;  %v287_v53 = vld [vmem:[%s2486_s15 + $0x350] sm:$0xff] }
  0xa2   : > { %471 = vxpose.xlu2.b32.cont [3/16] (narrow) %v263_v54, 8  ;;  %v304_v54 = vld [vmem:[%s2486_s15 + $0x3d8] sm:$0xff] }
  0xa3   : > { %439 = vxpose.xlu1.b32.cont [3/16] (narrow) %v247_v55, 8  ;;  %v288_v55 = vld [vmem:[%s2486_s15 + $0x358] sm:$0xff] }
  0xa4   : > { %407 = vxpose.xlu0.b32.cont [3/16] (narrow) %v231_v56, 8  ;;  %v2453_v56 = vmov 0  }
  0xaa   : > { %472 = vxpose.xlu2.b32.cont [4/16] (narrow) %v264_v57, 8  ;;  %v305_v57 = vld [vmem:[%s2486_s15 + $0x3e0] sm:$0xff] }
  0xab   : > { %440 = vxpose.xlu1.b32.cont [4/16] (narrow) %v248_v58, 8  ;;  %v289_v58 = vld [vmem:[%s2486_s15 + $0x360] sm:$0xff] }
  0xac   : > { %408 = vxpose.xlu0.b32.cont [4/16] (narrow) %v232_v59, 8  ;;  %v2614_v59 = vld [vmem:[%s3814_s0] sm:$0xff] }
  0xb2   : > { %473 = vxpose.xlu2.b32.cont [5/16] (narrow) %v265_v60, 8  ;;  %v306_v60 = vld [vmem:[%s2486_s15 + $0x3e8] sm:$0xff] }
  0xb3   : > { %441 = vxpose.xlu1.b32.cont [5/16] (narrow) %v249_v61, 8  ;;  %v290_v61 = vld [vmem:[%s2486_s15 + $0x368] sm:$0xff] }
  0xb4   : > { %409 = vxpose.xlu0.b32.cont [5/16] (narrow) %v233_v62, 8  ;;  %v154_v62 = vld [vmem:[%s3814_s0 + $0x38] sm:$0xff] }
  0xba   : > { %474 = vxpose.xlu2.b32.cont [6/16] (narrow) %v266_v63, 8  ;;  %v307_v63 = vld [vmem:[%s2486_s15 + $0x3f0] sm:$0xff] }
  0xbb   : > { %442 = vxpose.xlu1.b32.cont [6/16] (narrow) %v250_v0, 8  ;;  %v291_v0 = vld [vmem:[%s2486_s15 + $0x370] sm:$0xff] }
  0xbc   : > { %410 = vxpose.xlu0.b32.cont [6/16] (narrow) %v234_v1, 8  ;;  %v2454_v1 = vmov 1  }
  0xc2   : > { %475 = vxpose.xlu2.b32.cont [7/16] (narrow) %v267_v2, 8  ;;  %v308_v2 = vld [vmem:[%s2486_s15 + $0x3f8] sm:$0xff] }
  0xc3   : > { %443 = vxpose.xlu1.b32.cont [7/16] (narrow) %v251_v3, 8  ;;  %v292_v3 = vld [vmem:[%s2486_s15 + $0x378] sm:$0xff] }
  0xc4   : > { %411 = vxpose.xlu0.b32.cont [7/16] (narrow) %v235_v4, 8  ;;  %v2630_v4 = vld [vmem:[%s3814_s0 + $0x30] sm:$0xff] }
  0xca   : > { %476 = vxpose.xlu2.b32.cont [8/16] (narrow) %v268_v5, 8  ;;  %v152_v5 = vld [vmem:[%s3814_s0 + $0x28] sm:$0xff] }
  0xcb   : > { %444 = vxpose.xlu1.b32.cont [8/16] (narrow) %v252_v6, 8  ;;  %v171_v6 = vld [vmem:[%s3814_s0 + $0xc0] sm:$0xff] }
  0xcc   : > { %412 = vxpose.xlu0.b32.cont [8/16] (narrow) %v236_v7, 8  ;;  %v151_v7 = vld [vmem:[%s3814_s0 + $0x20] sm:$0xff] }
  0xd2   : > { %477 = vxpose.xlu2.b32.cont [9/16] (narrow) %v269_v8, 8  ;;  %v170_v8 = vld [vmem:[%s3814_s0 + $0xb8] sm:$0xff] }
  0xd3   : > { %445 = vxpose.xlu1.b32.cont [9/16] (narrow) %v253_v9, 8  ;;  %v389_v9 = vpop.trf.xlu2 }
  0xd4   : > { %413 = vxpose.xlu0.b32.cont [9/16] (narrow) %v237_v10, 8  ;;  %v150_v10 = vld [vmem:[%s3814_s0 + $0x18] sm:$0xff] }
  0xda   : > { %478 = vxpose.xlu2.b32.cont [10/16] (narrow) %v270_v11, 8  ;;  %v357_v11 = vpop.trf.xlu1 }
  0xdb   : > { %446 = vxpose.xlu1.b32.cont [10/16] (narrow) %v254_v12, 8 }
  0xdc   : > { %414 = vxpose.xlu0.b32.cont [10/16] (narrow) %v238_v13, 8  ;;  %v325_v13 = vpop.trf.xlu0 }
  0xe2   : > { %479 = vxpose.xlu2.b32.cont [11/16] (narrow) %v271_v14, 8 }
  0xe3   : > { %447 = vxpose.xlu1.b32.cont [11/16] (narrow) %v255_v15, 8 }
  0xe4   : > { %415 = vxpose.xlu0.b32.cont [11/16] (narrow) %v239_v16, 8 }
  0xea   : > { %480 = vxpose.xlu2.b32.cont [12/16] (narrow) %v272_v17, 8  ;;  %v169_v17 = vld [vmem:[%s3814_s0 + $0xb0] sm:$0xff] }
  0xeb   : > { %448 = vxpose.xlu1.b32.cont [12/16] (narrow) %v256_v18, 8 }
  0xec   : > { %416 = vxpose.xlu0.b32.cont [12/16] (narrow) %v240_v19, 8 }
  0xf2   : > { %481 = vxpose.xlu2.b32.cont [13/16] (narrow) %v273_v20, 8 }
  0xf3   : > { %449 = vxpose.xlu1.b32.cont [13/16] (narrow) %v257_v21, 8 }
  0xf4   : > { %417 = vxpose.xlu0.b32.cont [13/16] (narrow) %v241_v22, 8 }
  0xfa   : > { %482 = vxpose.xlu2.b32.cont [14/16] (narrow) %v274_v23, 8  ;;  %v149_v23 = vld [vmem:[%s3814_s0 + $0x10] sm:$0xff] }
  0xfb   : > { %450 = vxpose.xlu1.b32.cont [14/16] (narrow) %v258_v24, 8 }
  0xfc   : > { %418 = vxpose.xlu0.b32.cont [14/16] (narrow) %v242_v25, 8 }
 0x102   : > { %483 = vxpose.xlu2.b32.cont [15/16] (narrow) %v275_v26, 8 }
 0x103   : > { %451 = vxpose.xlu1.b32.cont [15/16] (narrow) %v259_v27, 8 }
 0x104   : > { %419 = vxpose.xlu0.b32.cont [15/16] (narrow) %v243_v28, 8 }
 0x10a   : > { %484 = vxpose.xlu2.b32.end [16/16] (narrow) %v276_v29, 8 }
 0x10b   : > { %452 = vxpose.xlu1.b32.end [16/16] (narrow) %v260_v30, 8 }
 0x10c   : > { %420 = vxpose.xlu0.b32.end [16/16] (narrow) %v244_v31, 8 }
 0x113   : > { %533 = vxpose.xlu1.b32.start [1/16] (narrow) %v293_v32, 8 }
 0x114   : > { %501 = vxpose.xlu0.b32.start [1/16] (narrow) %v277_v33, 8 }
 0x11b   : > { %534 = vxpose.xlu1.b32.cont [2/16] (narrow) %v294_v34, 8 }
 0x11c   : > { %502 = vxpose.xlu0.b32.cont [2/16] (narrow) %v278_v35, 8 }
 0x123   : > { %535 = vxpose.xlu1.b32.cont [3/16] (narrow) %v295_v36, 8 }
 0x124   : > { %503 = vxpose.xlu0.b32.cont [3/16] (narrow) %v279_v37, 8 }
 0x12b   : > { %536 = vxpose.xlu1.b32.cont [4/16] (narrow) %v296_v38, 8  ;;  %v485_v12 = vpop.trf.xlu2 }
 0x12c   : > { %504 = vxpose.xlu0.b32.cont [4/16] (narrow) %v280_v39, 8  ;;  %v2660_v18 = vperm.slane %v485_v12, 0  ;;  %v2672_v27 = vperm.slane %v485_v12, 1 }
 0x133   : > { %537 = vxpose.xlu1.b32.cont [5/16] (narrow) %v297_v40, 8 }
 0x134   : > { %505 = vxpose.xlu0.b32.cont [5/16] (narrow) %v281_v41, 8 }
 0x137   : > { %v453_v14 = vpop.trf.xlu1 }
 0x138   : > { %v421_v16 = vpop.trf.xlu0  ;;  %v2666_v24 = vperm.slane %v453_v14, 0  ;;  %v2674_v28 = vperm.slane %v453_v14, 1  ;;  %v165_v14 = vld [vmem:[%s3814_s0 + $0x90] sm:$0xff] }
 0x13a   : > { %3822 = vst [vmem:[#allocation3_spill] sm:$0xff] %v2674_v28 }
 0x13b   : > { %538 = vxpose.xlu1.b32.cont [6/16] (narrow) %v298_v42, 8 }
 0x13c   : > { %506 = vxpose.xlu0.b32.cont [6/16] (narrow) %v282_v43, 8 }
 0x143   : > { %539 = vxpose.xlu1.b32.cont [7/16] (narrow) %v299_v44, 8 }
 0x144   : > { %507 = vxpose.xlu0.b32.cont [7/16] (narrow) %v283_v45, 8  ;;  %v168_v45 = vld [vmem:[%s3814_s0 + $0xa8] sm:$0xff] }
 0x14b   : > { %540 = vxpose.xlu1.b32.cont [8/16] (narrow) %v300_v46, 8  ;;  %v148_v46 = vld [vmem:[%s3814_s0 + $0x8] sm:$0xff] }
 0x14c   : > { %508 = vxpose.xlu0.b32.cont [8/16] (narrow) %v284_v47, 8  ;;  %v2703_v47 = vperm.slane %v389_v9, 0 }
 0x153   : > { %541 = vxpose.xlu1.b32.cont [9/16] (narrow) %v301_v48, 8  ;;  %v2705_v48 = vperm.slane %v357_v11, 0 }
 0x154   : > { %509 = vxpose.xlu0.b32.cont [9/16] (narrow) %v285_v49, 8  ;;  %v2707_v49 = vperm.slane %v325_v13, 0 }
 0x15b   : > { %542 = vxpose.xlu1.b32.cont [10/16] (narrow) %v302_v50, 8  ;;  %v2709_v50 = vperm.slane %v421_v16, 0 }
 0x15c   : > { %510 = vxpose.xlu0.b32.cont [10/16] (narrow) %v286_v51, 8  ;;  %v2711_v51 = vperm.slane %v389_v9, 1  ;;  %v167_v9 = vld [vmem:[%s3814_s0 + $0xa0] sm:$0xff] }
 0x163   : > { %543 = vxpose.xlu1.b32.cont [11/16] (narrow) %v303_v52, 8  ;;  %v2713_v52 = vperm.slane %v357_v11, 1 }
 0x164   : > { %511 = vxpose.xlu0.b32.cont [11/16] (narrow) %v287_v53, 8  ;;  %v2715_v53 = vperm.slane %v325_v13, 1 }
 0x16b   : > { %544 = vxpose.xlu1.b32.cont [12/16] (narrow) %v304_v54, 8  ;;  %v2717_v54 = vperm.slane %v421_v16, 1 }
 0x16c   : > { %512 = vxpose.xlu0.b32.cont [12/16] (narrow) %v288_v55, 8  ;;  %2173 = vset.pattern.permute.xlu2 %v2453_v56 }
 0x173   : > { %545 = vxpose.xlu1.b32.cont [13/16] (narrow) %v305_v57, 8  ;;  %567 = vperm.xlu2 %2173, %v2614_v59  }
 0x174   : > { %513 = vxpose.xlu0.b32.cont [13/16] (narrow) %v289_v58, 8 }
 0x17b   : > { %546 = vxpose.xlu1.b32.cont [14/16] (narrow) %v306_v60, 8  ;;  %602 = vperm.xlu2 %2173, %v154_v62  }
 0x17c   : > { %514 = vxpose.xlu0.b32.cont [14/16] (narrow) %v290_v61, 8 }
 0x183   : > { %547 = vxpose.xlu1.b32.cont [15/16] (narrow) %v307_v63, 8  ;;  %2174 = vset.pattern.permute.xlu2 %v2454_v1 }
 0x184   : > { %515 = vxpose.xlu0.b32.cont [15/16] (narrow) %v291_v0, 8  ;;  %706 = vperm.xlu2 %2174, %v154_v62  }
 0x18b   : > { %548 = vxpose.xlu1.b32.end [16/16] (narrow) %v308_v2, 8 }
 0x18c   : > { %516 = vxpose.xlu0.b32.end [16/16] (narrow) %v292_v3, 8  ;;  %2175 = vset.pattern.permute.xlu2 %v2453_v56 }
 0x18d   : > { %597 = vperm.xlu2 %2175, %v2630_v4  }
 0x195   : > { %2178 = vset.pattern.permute.xlu2 %v2454_v1 }
 0x196   : > { %698 = vperm.xlu2 %2178, %v152_v5  }
 0x19e   : > { %2179 = vset.pattern.permute.xlu2 %v2453_v56 }
 0x19f   : > { %882 = vperm.xlu2 %2179, %v171_v6  }
 0x1a7   : > { %587 = vperm.xlu2 %2179, %v151_v7  }
 0x1af   : > { %2180 = vset.pattern.permute.xlu2 %v2454_v1 }
 0x1b0   : > { %694 = vperm.xlu2 %2180, %v151_v7  }
 0x1b7   : > { %v549_v20 = vpop.trf.xlu1 }
 0x1b8   : > { %2181 = vset.pattern.permute.xlu2 %v2453_v56  ;;  %v517_v21 = vpop.trf.xlu0  ;;  %v2668_v25 = vperm.slane %v549_v20, 0  ;;  %v2676_v29 = vperm.slane %v549_v20, 1 }
 0x1b9   : > { %877 = vperm.xlu2 %2181, %v170_v8   ;;  %v2670_v26 = vperm.slane %v517_v21, 0  ;;  %v2678_v30 = vperm.slane %v517_v21, 1 }
 0x1c1   : > { %582 = vperm.xlu2 %2181, %v150_v10  }
 0x1c9   : > { %2182 = vset.pattern.permute.xlu2 %v2454_v1 }
 0x1ca   : > { %690 = vperm.xlu2 %2182, %v150_v10  }
 0x1cd   : > { %v2654_v15 = vpop.permute.xlu2 %567 }
 0x1ce   : > { %3821 = vst [vmem:[#allocation2_spill] sm:$0xff] %v2654_v15  ;;  %v2724_v57 = vmul.f32 %v2660_v18, %v2654_v15 }
 0x1d0   : > { %3823 = vst [vmem:[#allocation4_spill] sm:$0xff] %v2724_v57 }
 0x1d2   : > { %2183 = vset.pattern.permute.xlu2 %v2453_v56 }
 0x1d3   : > { %872 = vperm.xlu2 %2183, %v169_v17  }
 0x1d5   : > { %v603_v19 = vpop.permute.xlu2 %602 }
 0x1d6   : > { %v674_v22 = vmul.f32 %v2660_v18, %v603_v19  ;;  %v673_v32 = vmul.f32 %v2666_v24, %v603_v19  ;;  %v675_v33 = vmul.f32 %v2670_v26, %v603_v19  ;;  %v676_v34 = vmul.f32 %v2668_v25, %v603_v19 }
 0x1d7   : > { %v669_v58 = vmul.f32 %v2707_v49, %v603_v19  ;;  %v670_v60 = vmul.f32 %v2705_v48, %v603_v19  ;;  %v671_v61 = vmul.f32 %v2703_v47, %v603_v19  ;;  %v672_v62 = vmul.f32 %v2709_v50, %v603_v19  ;;  %v164_v19 = vld [vmem:[%s3814_s0 + $0x88] sm:$0xff] }
 0x1db   : > { %577 = vperm.xlu2 %2183, %v149_v23  }
 0x1de   : > { %2177 = vset.pattern.permute.xlu1 %v2453_v56  ;;  %v707_v31 = vpop.permute.xlu2 %706 }
 0x1df   : > { %v777_v35 = vmul.f32 %v2674_v28, %v707_v31  ;;  %v778_v36 = vmul.f32 %v2672_v27, %v707_v31  ;;  %v779_v37 = vmul.f32 %v2678_v30, %v707_v31  ;;  %v780_v38 = vmul.f32 %v2676_v29, %v707_v31 }
 0x1e0   : > { %v773_v63 = vmul.f32 %v2715_v53, %v707_v31  ;;  %v774_v0 = vmul.f32 %v2713_v52, %v707_v31  ;;  %v775_v2 = vmul.f32 %v2711_v51, %v707_v31 }
 0x1e1   : > { %v841_v39 = vadd.f32 %v777_v35, %v673_v32  ;;  %v842_v40 = vadd.f32 %v778_v36, %v674_v22  ;;  %v843_v41 = vadd.f32 %v779_v37, %v675_v33  ;;  %v844_v42 = vadd.f32 %v780_v38, %v676_v34  ;;  %v166_v22 = vld [vmem:[%s3814_s0 + $0x98] sm:$0xff] }
 0x1e2   : > { %v837_v3 = vadd.f32 %v773_v63, %v669_v58  ;;  %v839_v6 = vadd.f32 %v775_v2, %v671_v61 }
 0x1e3   : > { %2184 = vset.pattern.permute.xlu2 %v2454_v1 }
 0x1e4   : > { %686 = vperm.xlu2 %2184, %v149_v23  }
 0x1e5   : > { %592 = vperm.xlu1 %2177, %v152_v5   ;;  %v838_v5 = vadd.f32 %v774_v0, %v670_v60  ;;  %v179_v0 = vld [vmem:[%s3814_s0 + $0x100] sm:$0xff] }
 0x1e7   : > { %v2689_v43 = vpop.permute.xlu2 %597 }
 0x1e8   : > { %v2693_v44 = vmul.f32 %v2660_v18, %v2689_v43 }
 0x1ec   : > { %2185 = vset.pattern.permute.xlu2 %v2453_v56 }
 0x1ed   : > { %2186 = vset.pattern.permute.xlu1 %v2454_v1  ;;  %867 = vperm.xlu2 %2185, %v168_v45  }
 0x1ee   : > { %682 = vperm.xlu1 %2186, %v148_v46  }
 0x1f0   : > { %v2719_v55 = vpop.permute.xlu2 %698 }
 0x1f3   : > { %2176 = vset.pattern.permute.xlu0 %v2454_v1  ;;  %v776_v1 = vmul.f32 %v2717_v54, %v707_v31  ;;  %v173_v31 = vld [vmem:[%s3814_s0 + $0xd0] sm:$0xff] }
 0x1f5   : > { %572 = vperm.xlu2 %2185, %v148_v46   ;;  %v840_v7 = vadd.f32 %v776_v1, %v672_v62  ;;  %v174_v1 = vld [vmem:[%s3814_s0 + $0xd8] sm:$0xff] }
 0x1f6   : > { %678 = vperm.xlu1 %2186, %v2614_v59  }
 0x1f9   : > { %v883_v8 = vpop.permute.xlu2 %882 }
 0x1fa   : > { %702 = vperm.xlu0 %2176, %v2630_v4   ;;  %v941_v10 = vadd.f32 %v883_v8, %v837_v3  ;;  %v942_v11 = vadd.f32 %v883_v8, %v838_v5  ;;  %v943_v12 = vadd.f32 %v883_v8, %v839_v6  ;;  %v944_v13 = vadd.f32 %v883_v8, %v840_v7  ;;  %v178_v6 = vld [vmem:[%s3814_s0 + $0xf8] sm:$0xff] }
 0x1fb   : > { %v2742_v59 = vadd.f32 %v883_v8, %v841_v39  ;;  %v2744_v16 = vadd.f32 %v883_v8, %v842_v40  ;;  %v2746_v17 = vadd.f32 %v883_v8, %v843_v41  ;;  %v2748_v4 = vadd.f32 %v883_v8, %v844_v42  ;;  %v172_v39 = vld [vmem:[%s3814_s0 + $0xc8] sm:$0xff]  ;;  %v175_v41 = vld [vmem:[%s3814_s0 + $0xe0] sm:$0xff] }
 0x1fc   : > { %2189 = vtanh.f32 %v941_v10 }
 0x1fd   : > { %862 = vperm.xlu2 %2185, %v167_v9   ;;  %2191 = vtanh.f32 %v942_v11 }
 0x1fe   : > { %2187 = vset.pattern.permute.xlu1 %v2453_v56  ;;  %2193 = vtanh.f32 %v943_v12 }
 0x1ff   : > { %852 = vperm.xlu1 %2187, %v165_v14   ;;  %2195 = vtanh.f32 %v944_v13 }
 0x200   : > { %2197 = vtanh.f32 %v2742_v59  ;;  %v759_v59 = vmul.f32 %v2711_v51, %v2719_v55 }
 0x201   : > { %v588_v20 = vpop.permute.xlu2 %587  ;;  %2199 = vtanh.f32 %v2744_v16 }
 0x202   : > { %2188 = vset.pattern.permute.xlu0 %v2453_v56  ;;  %v2190_v21 = vpop.eup %2189  ;;  %v176_v56 = vld [vmem:[%s3814_s0 + $0xe8] sm:$0xff]  ;;  %v650_v34 = vmul.f32 %v2660_v18, %v588_v20  ;;  %v645_v35 = vmul.f32 %v2707_v49, %v588_v20  ;;  %v646_v36 = vmul.f32 %v2705_v48, %v588_v20  ;;  %v648_v37 = vmul.f32 %v2709_v50, %v588_v20 }
 0x203   : > { %847 = vperm.xlu0 %2188, %v164_v19   ;;  %v2192_v23 = vpop.eup %2191  ;;  %1086 = vmatpush.msra.mxu0 %v2190_v21  ;;  %v647_v40 = vmul.f32 %v2703_v47, %v588_v20  ;;  %v649_v7 = vmul.f32 %v2666_v24, %v588_v20  ;;  %v651_v9 = vmul.f32 %v2670_v26, %v588_v20  ;;  %v177_v21 = vld [vmem:[%s3814_s0 + $0xf0] sm:$0xff]  ;;  %2201 = vtanh.f32 %v2746_v17 }
 0x204   : > { %v2194_v32 = vpop.eup %2193  ;;  %1127 = vmatpush.msra.mxu1 %v2192_v23  ;;  %v652_v11 = vmul.f32 %v2668_v25, %v588_v20  ;;  %v180_v23 = vld [vmem:[%s3814_s0 + $0x108] sm:$0x3]  ;;  %2203 = vtanh.f32 %v2748_v4 }
 0x205   : > { %v2196_v33 = vpop.eup %2195  ;;  %1168 = vmatpush.msra.mxu2 %v2194_v32  ;;  %857 = vperm.xlu2 %2185, %v166_v22  }
 0x206   : > { %1209 = vmatpush.msra.mxu3 %v2196_v33 }
 0x207   : > { %1020 = vperm.xlu1 %2187, %v173_v31  }
 0x20a   : > { %v695_v38 = vpop.permute.xlu2 %694 }
 0x20b   : > { %1035 = vperm.xlu0 %2188, %v176_v56   ;;  %v749_v42 = vmul.f32 %v2715_v53, %v695_v38  ;;  %v750_v45 = vmul.f32 %v2713_v52, %v695_v38  ;;  %v751_v46 = vmul.f32 %v2711_v51, %v695_v38  ;;  %v752_v58 = vmul.f32 %v2717_v54, %v695_v38 }
 0x20c   : > { %v754_v2 = vmul.f32 %v2672_v27, %v695_v38  ;;  %v753_v8 = vmul.f32 %v2674_v28, %v695_v38  ;;  %v755_v10 = vmul.f32 %v2678_v30, %v695_v38  ;;  %v756_v12 = vmul.f32 %v2676_v29, %v695_v38 }
 0x20d   : > { %1015 = vperm.xlu2 %2185, %v172_v39   ;;  %v2779_v60 = vadd.f32 %v749_v42, %v645_v35  ;;  %v2781_v61 = vadd.f32 %v750_v45, %v646_v36  ;;  %v2783_v62 = vadd.f32 %v751_v46, %v647_v40  ;;  %v2785_v63 = vadd.f32 %v752_v58, %v648_v37 }
 0x20e   : > { %v2794_v3 = vadd.f32 %v754_v2, %v650_v34  ;;  %v2807_v13 = vadd.f32 %v753_v8, %v649_v7  ;;  %v2809_v14 = vadd.f32 %v755_v10, %v651_v9  ;;  %v2811_v19 = vadd.f32 %v756_v12, %v652_v11 }
 0x20f   : > { %1030 = vperm.xlu1 %2187, %v175_v41   ;;  %v2845_v2 = vmul.f32 %v2707_v49, %v2654_v15  ;;  %v2857_v7 = vmul.f32 %v2709_v50, %v2654_v15  ;;  %v2861_v8 = vmul.f32 %v2707_v49, %v2689_v43  ;;  %v2865_v9 = vmul.f32 %v2705_v48, %v2689_v43 }
 0x210   : > { %v2869_v10 = vmul.f32 %v2703_v47, %v2689_v43  ;;  %v2873_v11 = vmul.f32 %v2709_v50, %v2689_v43  ;;  %v2878_v12 = vmul.f32 %v2666_v24, %v2689_v43 }
 0x211   : > { %3828 = vst [vmem:[#allocation9_spill] sm:$0xff] %v2845_v2 }
 0x212   : > { %3831 = vst [vmem:[#allocation12_spill] sm:$0xff] %v2857_v7 }
 0x213   : > { %1050 = vperm.xlu0 %2188, %v179_v0   ;;  %v2796_v5 = vpop.permute.xlu2 %877  ;;  %3832 = vst [vmem:[#allocation13_spill] sm:$0xff] %v2878_v12 }
 0x215   : > { %1025 = vperm.xlu2 %2185, %v174_v1   ;;  %v2849_v1 = vmul.f32 %v2705_v48, %v2654_v15 }
 0x217   : > { %1045 = vperm.xlu1 %2187, %v178_v6   ;;  %3829 = vst [vmem:[#allocation10_spill] sm:$0xff] %v2849_v1  ;;  %v2853_v6 = vmul.f32 %v2703_v47, %v2654_v15  ;;  %v2921_v15 = vpop.eup %2197 }
 0x218   : > { %3835 = vst [vmem:[#allocation16_spill] sm:$0xff] %v2921_v15 }
 0x219   : > { %3830 = vst [vmem:[#allocation11_spill] sm:$0xff] %v2853_v6 }
 0x21b   : > { %v583_v22 = vpop.permute.xlu2 %582 }
 0x21c   : > { %v642_v20 = vmul.f32 %v2660_v18, %v583_v22  ;;  %v641_v56 = vmul.f32 %v2666_v24, %v583_v22  ;;  %v643_v38 = vmul.f32 %v2670_v26, %v583_v22  ;;  %v644_v41 = vmul.f32 %v2668_v25, %v583_v22 }
 0x21d   : > { %1040 = vperm.xlu2 %2185, %v177_v21   ;;  %v2882_v21 = vmul.f32 %v2670_v26, %v2689_v43  ;;  %v639_v17 = vmul.f32 %v2703_v47, %v583_v22  ;;  %v640_v4 = vmul.f32 %v2709_v50, %v583_v22 }
 0x21f   : > { %3833 = vst [vmem:[#allocation14_spill] sm:$0xff] %v2882_v21  ;;  %v2927_v21 = vpop.eup %2199 }
 0x220   : > { %3836 = vst [vmem:[#allocation17_spill] sm:$0xff] %v2927_v21  ;;  %v2933_v12 = vpop.eup %2201 }
 0x221   : > { %3837 = vst [vmem:[#allocation18_spill] sm:$0xff] %v2933_v12  ;;  %v2936_v1 = vpop.eup %2203 }
 0x224   : > { %v691_v31 = vpop.permute.xlu2 %690 }
 0x225   : > { %1472 = vperm.xlu2 %2185, %v180_v23   ;;  %v746_v33 = vmul.f32 %v2672_v27, %v691_v31  ;;  %v745_v34 = vmul.f32 %v2674_v28, %v691_v31  ;;  %v747_v39 = vmul.f32 %v2678_v30, %v691_v31  ;;  %v748_v42 = vmul.f32 %v2676_v29, %v691_v31 }
 0x226   : > { %v2886_v23 = vmul.f32 %v2668_v25, %v2689_v43  ;;  %v2903_v43 = vmul.f32 %v2674_v28, %v2719_v55 }
 0x227   : > { %v2825_v35 = vadd.f32 %v746_v33, %v642_v20  ;;  %v2827_v36 = vadd.f32 %v745_v34, %v641_v56  ;;  %v2833_v40 = vadd.f32 %v747_v39, %v643_v38  ;;  %v2837_v45 = vadd.f32 %v748_v42, %v644_v41 }
 0x228   : > { %3834 = vst [vmem:[#allocation15_spill] sm:$0xff] %v2886_v23  ;;  %v757_v20 = vmul.f32 %v2715_v53, %v2719_v55  ;;  %v758_v33 = vmul.f32 %v2713_v52, %v2719_v55  ;;  %v760_v34 = vmul.f32 %v2717_v54, %v2719_v55  ;;  %v637_v41 = vmul.f32 %v2707_v49, %v583_v22 }
 0x229   : > { %3824 = vst [vmem:[#allocation5_spill] sm:$0xff] %v2825_v35  ;;  %v638_v42 = vmul.f32 %v2705_v48, %v583_v22  ;;  %v743_v23 = vmul.f32 %v2711_v51, %v691_v31 }
 0x22a   : > { %3825 = vst [vmem:[#allocation6_spill] sm:$0xff] %v2827_v36  ;;  %v742_v36 = vmul.f32 %v2713_v52, %v691_v31 }
 0x22b   : > { %3826 = vst [vmem:[#allocation7_spill] sm:$0xff] %v2833_v40 }
 0x22c   : > { %3827 = vst [vmem:[#allocation8_spill] sm:$0xff] %v2837_v45  ;;  %v806_v21 = vadd.f32 %v742_v36, %v638_v42 }
 0x22d   : > { %v2820_v32 = vpop.permute.xlu2 %872 }
 0x235   : > { %v2829_v37 = vpop.permute.xlu2 %577 }
 0x23e   : > { %v2839_v46 = vpop.permute.xlu2 %686 }
 0x247   : > { %v868_v58 = vpop.permute.xlu2 %867 }
 0x248   : > { %v917_v38 = vadd.f32 %v868_v58, %v2779_v60  ;;  %v918_v39 = vadd.f32 %v868_v58, %v2781_v61  ;;  %v919_v45 = vadd.f32 %v868_v58, %v2783_v62  ;;  %v741_v60 = vmul.f32 %v2715_v53, %v691_v31 }
 0x249   : > { %v920_v35 = vadd.f32 %v868_v58, %v2785_v63  ;;  %v921_v57 = vadd.f32 %v868_v58, %v2807_v13  ;;  %v744_v63 = vmul.f32 %v2717_v54, %v691_v31  ;;  %v922_v22 = vadd.f32 %v868_v58, %v2794_v3 }
 0x24a   : > { %2205 = vtanh.f32 %v917_v38  ;;  %v805_v6 = vadd.f32 %v741_v60, %v637_v41  ;;  %v923_v38 = vadd.f32 %v868_v58, %v2809_v14  ;;  %v924_v2 = vadd.f32 %v868_v58, %v2811_v19 }
 0x24b   : > { %2207 = vtanh.f32 %v918_v39  ;;  %v807_v31 = vadd.f32 %v743_v23, %v639_v17  ;;  %v733_v19 = vmul.f32 %v2715_v53, %v2839_v46  ;;  %v630_v58 = vmul.f32 %v2705_v48, %v2829_v37 }
 0x24c   : > { %2209 = vtanh.f32 %v919_v45  ;;  %v735_v23 = vmul.f32 %v2711_v51, %v2839_v46  ;;  %v736_v17 = vmul.f32 %v2717_v54, %v2839_v46 }
 0x24d   : > { %2211 = vtanh.f32 %v920_v35  ;;  %v629_v35 = vmul.f32 %v2707_v49, %v2829_v37 }
 0x24e   : > { %2213 = vtanh.f32 %v921_v57 }
 0x24f   : > { %v2841_v0 = vpop.permute.xlu2 %572  ;;  %2215 = vtanh.f32 %v922_v22  ;;  %v797_v60 = vadd.f32 %v733_v19, %v629_v35 }
 0x250   : > { %v2943_v14 = vpop.eup %2205  ;;  %2217 = vtanh.f32 %v923_v38 }
 0x251   : > { %v2950_v36 = vpop.eup %2207  ;;  %2219 = vtanh.f32 %v924_v2  ;;  %v632_v2 = vmul.f32 %v2709_v50, %v2829_v37 }
 0x253   : > { %v800_v19 = vadd.f32 %v736_v17, %v632_v2  ;;  %v623_v2 = vmul.f32 %v2703_v47, %v2841_v0 }
 0x257   : > { %v2895_v56 = vpop.permute.xlu1 %592  ;;  %v2914_v40 = vpop.permute.xlu2 %862 }
 0x258   : > { %v653_v16 = vmul.f32 %v2707_v49, %v2895_v56  ;;  %v654_v61 = vmul.f32 %v2705_v48, %v2895_v56  ;;  %v655_v62 = vmul.f32 %v2703_v47, %v2895_v56  ;;  %v656_v7 = vmul.f32 %v2709_v50, %v2895_v56 }
 0x259   : > { %v909_v39 = vadd.f32 %v2914_v40, %v805_v6  ;;  %v910_v45 = vadd.f32 %v2914_v40, %v806_v21  ;;  %v734_v6 = vmul.f32 %v2713_v52, %v2839_v46  ;;  %v631_v21 = vmul.f32 %v2703_v47, %v2829_v37 }
 0x25a   : > { %v821_v15 = vadd.f32 %v757_v20, %v653_v16  ;;  %v822_v13 = vadd.f32 %v758_v33, %v654_v61  ;;  %v823_v28 = vadd.f32 %v759_v59, %v655_v62  ;;  %v824_v12 = vadd.f32 %v760_v34, %v656_v7  ;;  %v2957_v7 = vpop.eup %2209 }
 0x25b   : > { %v808_v20 = vadd.f32 %v744_v63, %v640_v4  ;;  %2221 = vtanh.f32 %v909_v39  ;;  %v2964_v59 = vpop.eup %2211  ;;  %v911_v16 = vadd.f32 %v2914_v40, %v807_v31  ;;  %v798_v4 = vadd.f32 %v734_v6, %v630_v58 }
 0x25c   : > { %v925_v33 = vadd.f32 %v2820_v32, %v821_v15  ;;  %v926_v57 = vadd.f32 %v2820_v32, %v822_v13  ;;  %v927_v15 = vadd.f32 %v2820_v32, %v823_v28  ;;  %v928_v41 = vadd.f32 %v2820_v32, %v824_v12  ;;  %v2973_v42 = vpop.eup %2213 }
 0x25d   : > { %2223 = vtanh.f32 %v910_v45  ;;  %v657_v28 = vmul.f32 %v2666_v24, %v2895_v56  ;;  %3838 = vst [vmem:[#allocation19_spill] sm:$0xff] %v2973_v42  ;;  %v2978_v61 = vpop.eup %2215  ;;  %v912_v12 = vadd.f32 %v2914_v40, %v808_v20  ;;  %v658_v62 = vmul.f32 %v2660_v18, %v2895_v56  ;;  %v3848_v42 = vld [vmem:[#allocation12_spill] sm:$0xff] }
 0x25e   : > { %2225 = vtanh.f32 %v925_v33  ;;  %3839 = vst [vmem:[#allocation20_spill] sm:$0xff] %v2978_v61  ;;  %v2983_v63 = vpop.eup %2217  ;;  %v799_v38 = vadd.f32 %v735_v23, %v631_v21  ;;  %v762_v13 = vmul.f32 %v2672_v27, %v2719_v55  ;;  %v659_v33 = vmul.f32 %v2670_v26, %v2895_v56 }
 0x25f   : > { %v2966_v34 = vpop.permute.xlu2 %857  ;;  %2227 = vtanh.f32 %v926_v57  ;;  %3840 = vst [vmem:[#allocation21_spill] sm:$0xff] %v2983_v63  ;;  %v2988_v39 = vpop.eup %2219  ;;  %v825_v20 = vadd.f32 %v2903_v43, %v657_v28  ;;  %v763_v57 = vmul.f32 %v2678_v30, %v2719_v55  ;;  %v3002_v58 = vmul.f32 %v2676_v29, %v2719_v55 }
 0x260   : > { %v2940_v3 = vpop.permute.xlu1 %682  ;;  %2229 = vtanh.f32 %v927_v15  ;;  %v901_v22 = vadd.f32 %v2966_v34, %v797_v60  ;;  %3841 = vst [vmem:[#allocation22_spill] sm:$0xff] %v2988_v39  ;;  %v902_v45 = vadd.f32 %v2966_v34, %v798_v4  ;;  %v903_v15 = vadd.f32 %v2966_v34, %v799_v38 }
 0x261   : > { %2231 = vtanh.f32 %v928_v41  ;;  %v2996_v35 = vpop.eup %2221  ;;  %v621_v43 = vmul.f32 %v2707_v49, %v2841_v0  ;;  %v826_v21 = vadd.f32 %v762_v13, %v658_v62  ;;  %v622_v41 = vmul.f32 %v2705_v48, %v2841_v0 }
 0x262   : > { %2233 = vtanh.f32 %v911_v16  ;;  %v624_v55 = vmul.f32 %v2709_v50, %v2841_v0  ;;  %v904_v49 = vadd.f32 %v2966_v34, %v800_v19  ;;  %v929_v60 = vadd.f32 %v2820_v32, %v825_v20 }
 0x263   : > { %v3004_v6 = vpop.eup %2223  ;;  %2235 = vtanh.f32 %v912_v12  ;;  %v827_v17 = vadd.f32 %v763_v57, %v659_v33  ;;  %v930_v13 = vadd.f32 %v2820_v32, %v826_v21  ;;  %v727_v63 = vmul.f32 %v2711_v51, %v2940_v3 }
 0x264   : > { %v3009_v23 = vpop.eup %2225  ;;  %2237 = vtanh.f32 %v901_v22  ;;  %v725_v22 = vmul.f32 %v2715_v53, %v2940_v3 }
 0x265   : > { %v3017_v28 = vpop.eup %2227  ;;  %2239 = vtanh.f32 %v902_v45 }
 0x266   : > { %v3023_v12 = vpop.eup %2229  ;;  %2241 = vtanh.f32 %v903_v15  ;;  %v726_v15 = vmul.f32 %v2713_v52, %v2940_v3 }
 0x267   : > { %v3033_v62 = vpop.eup %2231  ;;  %2243 = vtanh.f32 %v904_v49 }
 0x268   : > { %v2990_v31 = vpop.permute.xlu1 %678  ;;  %v3040_v45 = vpop.eup %2233  ;;  %2245 = vtanh.f32 %v929_v60 }
 0x269   : > { %v3046_v39 = vpop.eup %2235  ;;  %2247 = vtanh.f32 %v930_v13  ;;  %v718_v60 = vmul.f32 %v2713_v52, %v2990_v31  ;;  %v931_v13 = vadd.f32 %v2820_v32, %v827_v17 }
 0x26a   : > { %v3055_v61 = vpop.eup %2237 }
 0x26c   : > { %v3019_v16 = vpop.permute.xlu0 %702 }
 0x26d   : > { %v765_v48 = vmul.f32 %v2715_v53, %v3019_v16  ;;  %v766_v47 = vmul.f32 %v2713_v52, %v3019_v16  ;;  %v767_v50 = vmul.f32 %v2711_v51, %v3019_v16  ;;  %v768_v4 = vmul.f32 %v2717_v54, %v3019_v16 }
 0x26e   : > { %v770_v38 = vmul.f32 %v2672_v27, %v3019_v16 }
 0x26f   : > { %v829_v20 = vadd.f32 %v765_v48, %v2861_v8  ;;  %v830_v33 = vadd.f32 %v766_v47, %v2865_v9  ;;  %v831_v19 = vadd.f32 %v767_v50, %v2869_v10  ;;  %v832_v57 = vadd.f32 %v768_v4, %v2873_v11  ;;  %v3060_v11 = vpop.eup %2239 }
 0x270   : > { %v3053_v21 = vadd.f32 %v770_v38, %v2693_v44  ;;  %v728_v47 = vmul.f32 %v2717_v54, %v2940_v3  ;;  %v660_v44 = vmul.f32 %v2668_v25, %v2895_v56  ;;  %v789_v50 = vadd.f32 %v725_v22, %v621_v43  ;;  %v3073_v38 = vpop.eup %2241  ;;  %v3842_v43 = vld [vmem:[#allocation3_spill] sm:$0xff] }
 0x271   : > { %v933_v8 = vadd.f32 %v2796_v5, %v829_v20  ;;  %v934_v9 = vadd.f32 %v2796_v5, %v830_v33  ;;  %v935_v10 = vadd.f32 %v2796_v5, %v831_v19  ;;  %v3062_v49 = vpop.permute.xlu1 %852  ;;  %v936_v48 = vadd.f32 %v2796_v5, %v832_v57 }
 0x272   : > { %v717_v4 = vmul.f32 %v2715_v53, %v2990_v31  ;;  %v790_v20 = vadd.f32 %v726_v15, %v622_v41  ;;  %v719_v33 = vmul.f32 %v2711_v51, %v2990_v31  ;;  %v893_v56 = vadd.f32 %v3062_v49, %v789_v50  ;;  %v3081_v53 = vpop.eup %2243 }
 0x273   : > { %2249 = vtanh.f32 %v933_v8  ;;  %v791_v19 = vadd.f32 %v727_v63, %v623_v2  ;;  %v769_v22 = vmul.f32 %v3842_v43, %v3019_v16  ;;  %v792_v41 = vadd.f32 %v728_v47, %v624_v55  ;;  %v3088_v15 = vpop.eup %2245  ;;  %v3843_v8 = vld [vmem:[#allocation9_spill] sm:$0xff]  ;;  %v3844_v2 = vld [vmem:[#allocation10_spill] sm:$0xff] }
 0x274   : > { %2251 = vtanh.f32 %v934_v9  ;;  %v894_v52 = vadd.f32 %v3062_v49, %v790_v20  ;;  %v720_v51 = vmul.f32 %v2717_v54, %v2990_v31  ;;  %v781_v63 = vadd.f32 %v717_v4, %v3843_v8  ;;  %v3095_v50 = vpop.eup %2247  ;;  %v3846_v20 = vld [vmem:[#allocation11_spill] sm:$0xff]  ;;  %v3847_v4 = vld [vmem:[#allocation13_spill] sm:$0xff] }
 0x275   : > { %2253 = vtanh.f32 %v935_v10  ;;  %v3083_v57 = vpop.permute.xlu0 %847  ;;  %v895_v17 = vadd.f32 %v3062_v49, %v791_v19  ;;  %v782_v9 = vadd.f32 %v718_v60, %v3844_v2  ;;  %v771_v10 = vmul.f32 %v2678_v30, %v3019_v16  ;;  %3845 = vst [vmem:[#allocation3_spill] sm:$0xff] %v3095_v50 }
 0x276   : > { %2255 = vtanh.f32 %v936_v48  ;;  %v896_v48 = vadd.f32 %v3062_v49, %v792_v41  ;;  %v783_v55 = vadd.f32 %v719_v33, %v3846_v20  ;;  %v772_v54 = vmul.f32 %v2676_v29, %v3019_v16  ;;  %v3850_v20 = vld [vmem:[#allocation4_spill] sm:$0xff] }
 0x277   : > { %2257 = vtanh.f32 %v931_v13  ;;  %v885_v19 = vadd.f32 %v3083_v57, %v781_v63  ;;  %v833_v8 = vadd.f32 %v769_v22, %v3847_v4  ;;  %v722_v60 = vmul.f32 %v2672_v27, %v2990_v31  ;;  %v3849_v63 = vld [vmem:[#allocation14_spill] sm:$0xff] }
 0x278   : > { %2259 = vtanh.f32 %v893_v56  ;;  %v886_v41 = vadd.f32 %v3083_v57, %v782_v9  ;;  %v784_v33 = vadd.f32 %v720_v51, %v3848_v42  ;;  %v738_v16 = vmul.f32 %v2672_v27, %v2839_v46 }
 0x279   : > { %v2250_v47 = vpop.eup %2249  ;;  %2261 = vtanh.f32 %v894_v52  ;;  %v887_v56 = vadd.f32 %v3083_v57, %v783_v55  ;;  %v835_v22 = vadd.f32 %v771_v10, %v3849_v63  ;;  %v3112_v4 = vadd.f32 %v722_v60, %v3850_v20  ;;  %v3851_v52 = vld [vmem:[#allocation15_spill] sm:$0xff] }
 0x27a   : > { %v2252_v2 = vpop.eup %2251  ;;  %1087 = vmatpush.msra.mxu0 %v2250_v47  ;;  %2263 = vtanh.f32 %v895_v17  ;;  %v888_v42 = vadd.f32 %v3083_v57, %v784_v33  ;;  %v836_v51 = vadd.f32 %v772_v54, %v3851_v52  ;;  %v633_v9 = vmul.f32 %v2666_v24, %v2829_v37 }
 0x27b   : > { %v2254_v13 = vpop.eup %2253  ;;  %1128 = vmatpush.msra.mxu1 %v2252_v2  ;;  %2265 = vtanh.f32 %v896_v48  ;;  %v937_v17 = vadd.f32 %v2796_v5, %v833_v8  ;;  %v828_v10 = vadd.f32 %v3002_v58, %v660_v44  ;;  %v737_v55 = vmul.f32 %v3842_v43, %v2839_v46 }
 0x27c   : > { %v2256_v50 = vpop.eup %2255  ;;  %1169 = vmatpush.msra.mxu2 %v2254_v13  ;;  %1088 = vmatpush.msra.mxu0 %v3009_v23  ;;  %2267 = vtanh.f32 %v885_v19  ;;  %v739_v48 = vmul.f32 %v2678_v30, %v2839_v46  ;;  %v940_v54 = vadd.f32 %v2796_v5, %v836_v51  ;;  %v625_v33 = vmul.f32 %v2666_v24, %v2841_v0 }
 0x27d   : > { %1210 = vmatpush.msra.mxu3 %v2256_v50  ;;  %1129 = vmatpush.msra.mxu1 %v3017_v28  ;;  %v3124_v23 = vpop.eup %2257  ;;  %2269 = vtanh.f32 %v886_v41  ;;  %v938_v50 = vadd.f32 %v2796_v5, %v3053_v21  ;;  %v635_v28 = vmul.f32 %v2670_v26, %v2829_v37  ;;  %v740_v21 = vmul.f32 %v2676_v29, %v2839_v46  ;;  %v3852_v46 = vld [vmem:[#allocation2_spill] sm:$0xff] }
 0x27e   : > { %1170 = vmatpush.msra.mxu2 %v3023_v12  ;;  %1089 = vmatpush.msra.mxu0 %v2943_v14  ;;  %v2260_v58 = vpop.eup %2259  ;;  %2271 = vtanh.f32 %v887_v56  ;;  %v939_v12 = vadd.f32 %v2796_v5, %v835_v22  ;;  %v636_v14 = vmul.f32 %v2668_v25, %v2829_v37  ;;  %v932_v47 = vadd.f32 %v2820_v32, %v828_v10  ;;  %v3853_v5 = vld [vmem:[#allocation6_spill] sm:$0xff]  ;;  %v3854_v32 = vld [vmem:[#allocation5_spill] sm:$0xff] }
 0x27f   : > { %1211 = vmatpush.msra.mxu3 %v3033_v62  ;;  %1130 = vmatpush.msra.mxu1 %v2950_v36  ;;  %v2262_v44 = vpop.eup %2261  ;;  %2273 = vtanh.f32 %v888_v42  ;;  %v634_v36 = vmul.f32 %v2660_v18, %v2829_v37  ;;  %v3151_v19 = vmul.f32 %v2666_v24, %v3852_v46  ;;  %v913_v37 = vadd.f32 %v2914_v40, %v3853_v5 }
 0x280   : > { %1171 = vmatpush.msra.mxu2 %v2957_v7  ;;  %1090 = vmatpush.msra.mxu0 %v2996_v35  ;;  %v2264_v62 = vpop.eup %2263  ;;  %2275 = vtanh.f32 %v937_v17  ;;  %v801_v35 = vadd.f32 %v737_v55, %v633_v9  ;;  %v803_v60 = vadd.f32 %v739_v48, %v635_v28  ;;  %v804_v2 = vadd.f32 %v740_v21, %v636_v14 }
 0x281   : > { %1212 = vmatpush.msra.mxu3 %v2964_v59  ;;  %1131 = vmatpush.msra.mxu1 %v3004_v6  ;;  %v2266_v7 = vpop.eup %2265  ;;  %2277 = vtanh.f32 %v938_v50  ;;  %v802_v59 = vadd.f32 %v738_v16, %v634_v36  ;;  %v914_v6 = vadd.f32 %v2914_v40, %v3854_v32  ;;  %v3172_v16 = vld [vmem:[%s3814_s0 + $0x40] sm:$0xff]  ;;  %v730_v24 = vmul.f32 %v2672_v27, %v2940_v3 }
 0x282   : > { %1172 = vmatpush.msra.mxu2 %v3040_v45  ;;  %1091 = vmatpush.msra.mxu0 %v3055_v61  ;;  %v2268_v8 = vpop.eup %2267  ;;  %2279 = vtanh.f32 %v939_v12  ;;  %v3855_v61 = vld [vmem:[#allocation7_spill] sm:$0xff]  ;;  %v627_v63 = vmul.f32 %v2670_v26, %v2841_v0  ;;  %v731_v22 = vmul.f32 %v2678_v30, %v2940_v3  ;;  %v626_v27 = vmul.f32 %v2660_v18, %v2841_v0  ;;  %v3858_v12 = vld [vmem:[#allocation17_spill] sm:$0xff] }
 0x283   : > { %1213 = vmatpush.msra.mxu3 %v3046_v39  ;;  %1132 = vmatpush.msra.mxu1 %v3060_v11  ;;  %v2270_v45 = vpop.eup %2269  ;;  %2281 = vtanh.f32 %v940_v54  ;;  %v915_v41 = vadd.f32 %v2914_v40, %v3855_v61  ;;  %v729_v39 = vmul.f32 %v3842_v43, %v2940_v3  ;;  %v732_v42 = vmul.f32 %v2676_v29, %v2940_v3  ;;  %v3859_v54 = vld [vmem:[#allocation18_spill] sm:$0xff] }
 0x284   : > { %1173 = vmatpush.msra.mxu2 %v3073_v38  ;;  %1092 = vmatpush.msra.mxu0 %v2260_v58  ;;  %v2272_v11 = vpop.eup %2271  ;;  %2283 = vtanh.f32 %v932_v47  ;;  %v3856_v38 = vld [vmem:[#allocation8_spill] sm:$0xff]  ;;  %v907_v51 = vadd.f32 %v2966_v34, %v803_v60  ;;  %v721_v17 = vmul.f32 %v3842_v43, %v2990_v31  ;;  %v908_v18 = vadd.f32 %v2966_v34, %v804_v2 }
 0x285   : > { %1214 = vmatpush.msra.mxu3 %v3081_v53  ;;  %1133 = vmatpush.msra.mxu1 %v2262_v44  ;;  %v916_v13 = vadd.f32 %v2914_v40, %v3856_v38  ;;  %v2274_v56 = vpop.eup %2273  ;;  %2285 = vtanh.f32 %v913_v37  ;;  %v905_v53 = vadd.f32 %v2966_v34, %v801_v35  ;;  %v906_v40 = vadd.f32 %v2966_v34, %v802_v59  ;;  %v3857_v34 = vld [vmem:[#allocation16_spill] sm:$0xff]  ;;  %v3861_v59 = vld [vmem:[#allocation19_spill] sm:$0xff] }
 0x286   : > { %1174 = vmatpush.msra.mxu2 %v2264_v62  ;;  %1093 = vmatpush.msra.mxu0 %v2268_v8  ;;  %v2276_v20 = vpop.eup %2275  ;;  %2287 = vtanh.f32 %v914_v6  ;;  %v793_v9 = vadd.f32 %v729_v39, %v625_v33  ;;  %v794_v3 = vadd.f32 %v730_v24, %v626_v27  ;;  %v628_v55 = vmul.f32 %v2668_v25, %v2841_v0  ;;  %v3862_v8 = vld [vmem:[#allocation20_spill] sm:$0xff]  ;;  %v3863_v6 = vld [vmem:[#allocation21_spill] sm:$0xff]  ;;  %v159_v24 = vld [vmem:[%s3814_s0 + $0x60] sm:$0xff] }
 0x287   : > { %1215 = vmatpush.msra.mxu3 %v2266_v7  ;;  %1134 = vmatpush.msra.mxu1 %v2270_v45  ;;  %v2278_v52 = vpop.eup %2277  ;;  %2289 = vtanh.f32 %v915_v41  ;;  %v795_v28 = vadd.f32 %v731_v22, %v627_v63  ;;  %v723_v48 = vmul.f32 %v2678_v30, %v2990_v31  ;;  %v724_v21 = vmul.f32 %v2676_v29, %v2990_v31  ;;  %v162_v63 = vld [vmem:[%s3814_s0 + $0x78] sm:$0xff] }
 0x288   : > { %1175 = vmatpush.msra.mxu2 %v2272_v11  ;;  %2088 = vmatmul.msk.f32.vlgmr.msra.gmra.mxu0 %vm1053_vm0, %v3172_v16  ;;  %v2280_v10 = vpop.eup %2279  ;;  %2291 = vtanh.f32 %v916_v13  ;;  %v897_v43 = vadd.f32 %v3062_v49, %v793_v9  ;;  %v898_v0 = vadd.f32 %v3062_v49, %v794_v3  ;;  %v796_v14 = vadd.f32 %v732_v42, %v628_v55  ;;  %v157_v11 = vld [vmem:[%s3814_s0 + $0x50] sm:$0xff]  ;;  %v158_v13 = vld [vmem:[%s3814_s0 + $0x58] sm:$0xff] }
 0x289   : > { %1216 = vmatpush.msra.mxu3 %v2274_v56  ;;  %2096 = vmatmul.msk.f32.vlgmr.msra.gmra.mxu1 %vm1053_vm0, %v3172_v16  ;;  %v2282_v50 = vpop.eup %2281  ;;  %2293 = vtanh.f32 %v905_v53  ;;  %v899_v30 = vadd.f32 %v3062_v49, %v795_v28  ;;  %v785_v36 = vadd.f32 %v721_v17, %v3151_v19  ;;  %v619_v62 = vmul.f32 %v2670_v26, %v3852_v46  ;;  %v3860_v26 = vld [vmem:[#allocation3_spill] sm:$0xff]  ;;  %v161_v53 = vld [vmem:[%s3814_s0 + $0x70] sm:$0xff] }
 0x28a   : > { %2104 = vmatmul.msk.f32.vlgmr.msra.gmra.mxu2 %vm1053_vm0, %v3172_v16  ;;  %2112 = vmatmul.msk.f32.vlgmr.msra.gmra.mxu3 %vm1053_vm0, %v3172_v16  ;;  %v2284_v58 = vpop.eup %2283  ;;  %2295 = vtanh.f32 %v906_v40  ;;  %v900_v7 = vadd.f32 %v3062_v49, %v796_v14  ;;  %v620_v29 = vmul.f32 %v2668_v25, %v3852_v46  ;;  %v890_v37 = vadd.f32 %v3083_v57, %v3112_v4  ;;  %v3228_v25 = vld [vmem:[%s3814_s0 + $0x48] sm:$0xff] }
 0x28b   : > { %1250 = vmatpush.msrb.mxu0 %v3857_v34  ;;  %1291 = vmatpush.msrb.mxu1 %v3858_v12  ;;  %v2286_v44 = vpop.eup %2285  ;;  %2297 = vtanh.f32 %v907_v51  ;;  %v787_v5 = vadd.f32 %v723_v48, %v619_v62  ;;  %v160_v56 = vld [vmem:[%s3814_s0 + $0x68] sm:$0xff]  ;;  %v3344_v34 = vpop.permute.xlu2 %1015 }
 0x28c   : > { %1332 = vmatpush.msrb.mxu2 %v3859_v54  ;;  %1373 = vmatpush.msrb.mxu3 %v2936_v1  ;;  %v2288_v47 = vpop.eup %2287  ;;  %2299 = vtanh.f32 %v908_v18  ;;  %v889_v1 = vadd.f32 %v3083_v57, %v785_v36  ;;  %v788_v49 = vadd.f32 %v724_v21, %v620_v29 }
 0x28d   : > { %1251 = vmatpush.msrb.mxu0 %v2276_v20  ;;  %1292 = vmatpush.msrb.mxu1 %v2278_v52  ;;  %v2290_v31 = vpop.eup %2289  ;;  %2301 = vtanh.f32 %v897_v43  ;;  %v891_v46 = vadd.f32 %v3083_v57, %v787_v5 }
 0x28e   : > { %1333 = vmatpush.msrb.mxu2 %v2280_v10  ;;  %1374 = vmatpush.msrb.mxu3 %v2282_v50  ;;  %v2292_v19 = vpop.eup %2291  ;;  %2303 = vtanh.f32 %v898_v0  ;;  %v892_v4 = vadd.f32 %v3083_v57, %v788_v49 }
 0x28f   : > { %1252 = vmatpush.msrb.mxu0 %v3088_v15  ;;  %1293 = vmatpush.msrb.mxu1 %v3860_v26  ;;  %v2294_v35 = vpop.eup %2293  ;;  %2305 = vtanh.f32 %v899_v30 }
 0x290   : > { %1334 = vmatpush.msrb.mxu2 %v3124_v23  ;;  %1375 = vmatpush.msrb.mxu3 %v2284_v58  ;;  %v2296_v15 = vpop.eup %2295  ;;  %2307 = vtanh.f32 %v900_v7  ;;  %v3864_v23 = vld [vmem:[#allocation22_spill] sm:$0xff]  ;;  %v3342_v58 = vpop.permute.xlu1 %1020 }
 0x291   : > { %1253 = vmatpush.msrb.mxu0 %v3861_v59  ;;  %1294 = vmatpush.msrb.mxu1 %v3862_v8  ;;  %v2298_v32 = vpop.eup %2297  ;;  %2309 = vtanh.f32 %v889_v1 }
 0x292   : > { %1335 = vmatpush.msrb.mxu2 %v3863_v6  ;;  %1376 = vmatpush.msrb.mxu3 %v3864_v23  ;;  %v2300_v60 = vpop.eup %2299  ;;  %2311 = vtanh.f32 %v890_v37 }
 0x293   : > { %2089 = vmatmul.msk.f32.gmra.mxu0 %vm1053_vm0, %v3228_v25  ;;  %2097 = vmatmul.msk.f32.gmra.mxu1 %vm1053_vm0, %v3228_v25  ;;  %v2302_v2 = vpop.eup %2301  ;;  %2313 = vtanh.f32 %v891_v46  ;;  %v3359_v1 = vpop.permute.xlu2 %1025 }
 0x294   : > { %2105 = vmatmul.msk.f32.gmra.mxu2 %vm1053_vm0, %v3228_v25  ;;  %2113 = vmatmul.msk.f32.gmra.mxu3 %vm1053_vm0, %v3228_v25  ;;  %v2304_v57 = vpop.eup %2303  ;;  %2315 = vtanh.f32 %v892_v4 }
 0x295   : > { %1254 = vmatpush.msrb.mxu0 %v2286_v44  ;;  %1295 = vmatpush.msrb.mxu1 %v2288_v47  ;;  %v2306_v45 = vpop.eup %2305  ;;  %v3350_v44 = vpop.permute.xlu0 %1035 }
 0x296   : > { %1336 = vmatpush.msrb.mxu2 %v2290_v31  ;;  %1377 = vmatpush.msrb.mxu3 %v2292_v19  ;;  %v2308_v61 = vpop.eup %2307 }
 0x297   : > { %1255 = vmatpush.msrb.mxu0 %v2294_v35  ;;  %1296 = vmatpush.msrb.mxu1 %v2296_v15  ;;  %v2310_v41 = vpop.eup %2309 }
 0x298   : > { %1337 = vmatpush.msrb.mxu2 %v2298_v32  ;;  %1378 = vmatpush.msrb.mxu3 %v2300_v60  ;;  %v2312_v33 = vpop.eup %2311  ;;  %v3352_v54 = vpop.permute.xlu1 %1030 }
 0x299   : > { %1256 = vmatpush.msrb.mxu0 %v2302_v2  ;;  %1297 = vmatpush.msrb.mxu1 %v2304_v57  ;;  %v2314_v39 = vpop.eup %2313 }
 0x29a   : > { %1338 = vmatpush.msrb.mxu2 %v2306_v45  ;;  %1379 = vmatpush.msrb.mxu3 %v2308_v61  ;;  %v2316_v38 = vpop.eup %2315 }
 0x29b   : > { %1257 = vmatpush.msrb.mxu0 %v2310_v41  ;;  %1298 = vmatpush.msrb.mxu1 %v2312_v33  ;;  %v3383_v41 = vpop.permute.xlu2 %1040 }
 0x29c   : > { %1339 = vmatpush.msrb.mxu2 %v2314_v39  ;;  %1380 = vmatpush.msrb.mxu3 %v2316_v38 }
 0x29d   : > { %2090 = vmatmul.msk.f32.gmra.mxu0 %vm1053_vm0, %v157_v11  ;;  %2098 = vmatmul.msk.f32.gmra.mxu1 %vm1053_vm0, %v157_v11  ;;  %v3366_v35 = vpop.permute.xlu0 %1050 }
 0x29e   : > { %2106 = vmatmul.msk.f32.gmra.mxu2 %vm1053_vm0, %v157_v11  ;;  %2114 = vmatmul.msk.f32.gmra.mxu3 %vm1053_vm0, %v157_v11 }
 0x2a0   : > { %v3374_v23 = vpop.permute.xlu1 %1045 }
 0x2a5   : > { %2091 = vmatmul.msk.f32.gmra.mxu0 %vm1053_vm0, %v158_v13  ;;  %2099 = vmatmul.msk.f32.gmra.mxu1 %vm1053_vm0, %v158_v13 }
 0x2a6   : > { %2107 = vmatmul.msk.f32.gmra.mxu2 %vm1053_vm0, %v158_v13  ;;  %2115 = vmatmul.msk.f32.gmra.mxu3 %vm1053_vm0, %v158_v13 }
 0x2ad   : > { %2092 = vmatmul.msk.f32.gmra.mxu0 %vm1053_vm0, %v159_v24  ;;  %2100 = vmatmul.msk.f32.gmra.mxu1 %vm1053_vm0, %v159_v24 }
 0x2ae   : > { %2108 = vmatmul.msk.f32.gmra.mxu2 %vm1053_vm0, %v159_v24  ;;  %2116 = vmatmul.msk.f32.gmra.mxu3 %vm1053_vm0, %v159_v24 }
 0x2b5   : > { %2093 = vmatmul.msk.f32.gmra.mxu0 %vm1053_vm0, %v160_v56  ;;  %2101 = vmatmul.msk.f32.gmra.mxu1 %vm1053_vm0, %v160_v56 }
 0x2b6   : > { %2109 = vmatmul.msk.f32.gmra.mxu2 %vm1053_vm0, %v160_v56  ;;  %2117 = vmatmul.msk.f32.gmra.mxu3 %vm1053_vm0, %v160_v56 }
 0x2bd   : > { %2094 = vmatmul.msk.f32.gmra.mxu0 %vm1053_vm0, %v161_v53  ;;  %2102 = vmatmul.msk.f32.gmra.mxu1 %vm1053_vm0, %v161_v53 }
 0x2be   : > { %2110 = vmatmul.msk.f32.gmra.mxu2 %vm1053_vm0, %v161_v53  ;;  %2118 = vmatmul.msk.f32.gmra.mxu3 %vm1053_vm0, %v161_v53 }
 0x2c5   : > { %2095 = vmatmul.msk.f32.gmra.mxu0 %vm1053_vm0, %v162_v63  ;;  %2103 = vmatmul.msk.f32.gmra.mxu1 %vm1053_vm0, %v162_v63 }
 0x2c6   : > { %2111 = vmatmul.msk.f32.gmra.mxu2 %vm1053_vm0, %v162_v63  ;;  %2119 = vmatmul.msk.f32.gmra.mxu3 %vm1053_vm0, %v162_v63 }
 0x2cd   : > { %2120 = vmatmul.msk.f32.vlgmr.msrb.gmra.mxu0 %vm1053_vm0, %v3172_v16  ;;  %2128 = vmatmul.msk.f32.vlgmr.msrb.gmra.mxu1 %vm1053_vm0, %v3172_v16 }
 0x2ce   : > { %2136 = vmatmul.msk.f32.vlgmr.msrb.gmra.mxu2 %vm1053_vm0, %v3172_v16  ;;  %2144 = vmatmul.msk.f32.vlgmr.msrb.gmra.mxu3 %vm1053_vm0, %v3172_v16 }
 0x2d5   : > { %2121 = vmatmul.msk.f32.gmra.mxu0 %vm1053_vm0, %v3228_v25  ;;  %2129 = vmatmul.msk.f32.gmra.mxu1 %vm1053_vm0, %v3228_v25 }
 0x2d6   : > { %2137 = vmatmul.msk.f32.gmra.mxu2 %vm1053_vm0, %v3228_v25  ;;  %2145 = vmatmul.msk.f32.gmra.mxu3 %vm1053_vm0, %v3228_v25 }
 0x2dd   : > { %2122 = vmatmul.msk.f32.gmra.mxu0 %vm1053_vm0, %v157_v11  ;;  %2130 = vmatmul.msk.f32.gmra.mxu1 %vm1053_vm0, %v157_v11 }
 0x2de   : > { %2138 = vmatmul.msk.f32.gmra.mxu2 %vm1053_vm0, %v157_v11  ;;  %2146 = vmatmul.msk.f32.gmra.mxu3 %vm1053_vm0, %v157_v11 }
 0x2e5   : > { %2123 = vmatmul.msk.f32.gmra.mxu0 %vm1053_vm0, %v158_v13  ;;  %2131 = vmatmul.msk.f32.gmra.mxu1 %vm1053_vm0, %v158_v13 }
 0x2e6   : > { %2139 = vmatmul.msk.f32.gmra.mxu2 %vm1053_vm0, %v158_v13  ;;  %2147 = vmatmul.msk.f32.gmra.mxu3 %vm1053_vm0, %v158_v13 }
 0x2ed   : > { %2124 = vmatmul.msk.f32.gmra.mxu0 %vm1053_vm0, %v159_v24  ;;  %2132 = vmatmul.msk.f32.gmra.mxu1 %vm1053_vm0, %v159_v24 }
 0x2ee   : > { %2140 = vmatmul.msk.f32.gmra.mxu2 %vm1053_vm0, %v159_v24  ;;  %2148 = vmatmul.msk.f32.gmra.mxu3 %vm1053_vm0, %v159_v24 }
 0x2f5   : > { %2125 = vmatmul.msk.f32.gmra.mxu0 %vm1053_vm0, %v160_v56  ;;  %2133 = vmatmul.msk.f32.gmra.mxu1 %vm1053_vm0, %v160_v56 }
 0x2f6   : > { %2141 = vmatmul.msk.f32.gmra.mxu2 %vm1053_vm0, %v160_v56  ;;  %2149 = vmatmul.msk.f32.gmra.mxu3 %vm1053_vm0, %v160_v56 }
 0x2fd   : > { %2126 = vmatmul.msk.f32.gmra.mxu0 %vm1053_vm0, %v161_v53  ;;  %2134 = vmatmul.msk.f32.gmra.mxu1 %vm1053_vm0, %v161_v53 }
 0x2fe   : > { %2142 = vmatmul.msk.f32.gmra.mxu2 %vm1053_vm0, %v161_v53  ;;  %2150 = vmatmul.msk.f32.gmra.mxu3 %vm1053_vm0, %v161_v53 }
 0x305   : > { %2127 = vmatmul.msk.f32.gmra.mxu0 %vm1053_vm0, %v162_v63  ;;  %2135 = vmatmul.msk.f32.gmra.mxu1 %vm1053_vm0, %v162_v63  ;;  %v1095_v16 = vpop.f32.mrf.mxu0 }
 0x306   : > { %2143 = vmatmul.msk.f32.gmra.mxu2 %vm1053_vm0, %v162_v63  ;;  %2151 = vmatmul.msk.f32.gmra.mxu3 %vm1053_vm0, %v162_v63  ;;  %v1136_v22 = vpop.f32.mrf.mxu1  ;;  %v1096_v30 = vadd.f32 %v1095_v16, %v3344_v34 }
 0x307   : > { %v1137_v36 = vadd.f32 %v1136_v22, %v3344_v34 }
 0x308   : > { %2317 = vtanh.f32 %v1096_v30 }
 0x309   : > { %2319 = vtanh.f32 %v1137_v36 }
 0x30d   : > { %v3326_v20 = vpop.f32.mrf.mxu2  ;;  %v3328_v40 = vpop.f32.mrf.mxu3 }
 0x30e   : > { %v3370_v8 = vpop.eup %2317 }
 0x30f   : > { %v3372_v6 = vpop.eup %2319 }
 0x310   : > { %v1098_v27 = vpop.f32.mrf.mxu0  ;;  %v1139_v42 = vpop.f32.mrf.mxu1 }
 0x311   : > { %v1099_v7 = vadd.f32 %v1098_v27, %v3342_v58  ;;  %v1140_v5 = vadd.f32 %v1139_v42, %v3342_v58 }
 0x313   : > { %2321 = vtanh.f32 %v1099_v7 }
 0x314   : > { %2323 = vtanh.f32 %v1140_v5 }
 0x317   : > { %v3330_v52 = vpop.f32.mrf.mxu2  ;;  %v3332_v51 = vpop.f32.mrf.mxu3 }
 0x319   : > { %v3378_v57 = vpop.eup %2321 }
 0x31a   : > { %v1101_v9 = vpop.f32.mrf.mxu0  ;;  %v1142_v17 = vpop.f32.mrf.mxu1 }
 0x31b   : > { %v1102_v19 = vadd.f32 %v1101_v9, %v3359_v1  ;;  %v1143_v26 = vadd.f32 %v1142_v17, %v3359_v1  ;;  %v3381_v61 = vpop.eup %2323 }
 0x31d   : > { %2325 = vtanh.f32 %v1102_v19 }
 0x31e   : > { %2327 = vtanh.f32 %v1143_v26 }
 0x321   : > { %v3334_v10 = vpop.f32.mrf.mxu2  ;;  %v3336_v18 = vpop.f32.mrf.mxu3 }
 0x322   : > { %v1104_v3 = vpop.f32.mrf.mxu0  ;;  %v1145_v55 = vpop.f32.mrf.mxu1 }
 0x323   : > { %v1105_v37 = vadd.f32 %v1104_v3, %v3352_v54  ;;  %v1146_v49 = vadd.f32 %v1145_v55, %v3352_v54  ;;  %v3386_v39 = vpop.eup %2325 }
 0x324   : > { %v3389_v38 = vpop.eup %2327 }
 0x325   : > { %2329 = vtanh.f32 %v1105_v37 }
 0x326   : > { %2331 = vtanh.f32 %v1146_v49 }
 0x329   : > { %v3338_v50 = vpop.f32.mrf.mxu2  ;;  %v3340_v43 = vpop.f32.mrf.mxu3 }
 0x32a   : > { %v1107_v28 = vpop.f32.mrf.mxu0  ;;  %v1148_v48 = vpop.f32.mrf.mxu1  ;;  %v1228_v5 = vadd.f32 %v3340_v43, %v3352_v54  ;;  %v1225_v43 = vadd.f32 %v3336_v18, %v3359_v1  ;;  %v1178_v18 = vadd.f32 %v3326_v20, %v3344_v34 }
 0x32b   : > { %v1108_v25 = vadd.f32 %v1107_v28, %v3350_v44  ;;  %v1149_v46 = vadd.f32 %v1148_v48, %v3350_v44  ;;  %v2330_v24 = vpop.eup %2329 }
 0x32c   : > { %v2332_v56 = vpop.eup %2331 }
 0x32d   : > { %2333 = vtanh.f32 %v1108_v25 }
 0x32e   : > { %2335 = vtanh.f32 %v1149_v46  ;;  %v1181_v46 = vadd.f32 %v3330_v52, %v3342_v58  ;;  %v1219_v52 = vadd.f32 %v3328_v40, %v3344_v34 }
 0x331   : > { %v3346_v12 = vpop.f32.mrf.mxu2  ;;  %v3348_v0 = vpop.f32.mrf.mxu3 }
 0x332   : > { %v1110_v14 = vpop.f32.mrf.mxu0  ;;  %v1151_v21 = vpop.f32.mrf.mxu1  ;;  %v1190_v36 = vadd.f32 %v3346_v12, %v3350_v44 }
 0x333   : > { %v1111_v11 = vadd.f32 %v1110_v14, %v3383_v41  ;;  %v1152_v13 = vadd.f32 %v1151_v21, %v3383_v41  ;;  %v2334_v16 = vpop.eup %2333 }
 0x334   : > { %v2336_v3 = vpop.eup %2335 }
 0x339   : > { %v1192_v62 = vpop.f32.mrf.mxu2  ;;  %v3356_v47 = vpop.f32.mrf.mxu3 }
 0x33a   : > { %v1113_v29 = vpop.f32.mrf.mxu0  ;;  %v1154_v31 = vpop.f32.mrf.mxu1  ;;  %v1193_v48 = vadd.f32 %v1192_v62, %v3383_v41  ;;  %v1234_v21 = vadd.f32 %v3356_v47, %v3383_v41 }
 0x33b   : > { %v1114_v45 = vadd.f32 %v1113_v29, %v3374_v23  ;;  %v1155_v33 = vadd.f32 %v1154_v31, %v3374_v23  ;;  %v1231_v29 = vadd.f32 %v3348_v0, %v3350_v44  ;;  %v1187_v31 = vadd.f32 %v3338_v50, %v3352_v54 }
 0x33c   : > { %v1184_v0 = vadd.f32 %v3334_v10, %v3359_v1 }
 0x341   : > { %v1195_v15 = vpop.f32.mrf.mxu2  ;;  %v1236_v59 = vpop.f32.mrf.mxu3 }
 0x342   : > { %v1116_v4 = vpop.f32.mrf.mxu0  ;;  %v1157_v32 = vpop.f32.mrf.mxu1  ;;  %v1196_v22 = vadd.f32 %v1195_v15, %v3374_v23  ;;  %v1237_v55 = vadd.f32 %v1236_v59, %v3374_v23  ;;  %v1222_v15 = vadd.f32 %v3332_v51, %v3342_v58 }
 0x343   : > { %v1117_v60 = vadd.f32 %v1116_v4, %v3366_v35  ;;  %v1158_v2 = vadd.f32 %v1157_v32, %v3366_v35 }
 0x345   : > { %2337 = vtanh.f32 %v1117_v60 }
 0x346   : > { %2339 = vtanh.f32 %v1158_v2 }
 0x347   : > { %2341 = vtanh.f32 %v1114_v45 }
 0x348   : > { %2343 = vtanh.f32 %v1155_v33  ;;  %v3442_v33 = vld [vmem:[%s3814_s0 + $0x80] sm:$0x3] }
 0x349   : > { %v1198_v53 = vpop.f32.mrf.mxu2  ;;  %v1239_v63 = vpop.f32.mrf.mxu3  ;;  %2345 = vtanh.f32 %v1111_v11 }
 0x34a   : > { %v1199_v27 = vadd.f32 %v1198_v53, %v3366_v35  ;;  %v1240_v42 = vadd.f32 %v1239_v63, %v3366_v35  ;;  %v3395_v9 = vpop.f32.mrf.mxu0  ;;  %v3397_v17 = vpop.f32.mrf.mxu1  ;;  %2347 = vtanh.f32 %v1152_v13 }
 0x34b   : > { %v2338_v28 = vpop.eup %2337 }
 0x34c   : > { %2349 = vtanh.f32 %v1199_v27  ;;  %v2340_v14 = vpop.eup %2339  ;;  %1486 = vmatpush.msra.mxu0 %v2338_v28 }
 0x34d   : > { %2351 = vtanh.f32 %v1240_v42  ;;  %v2342_v30 = vpop.eup %2341  ;;  %1506 = vmatpush.msra.mxu1 %v2340_v14  ;;  %v1301_v14 = vadd.f32 %v3397_v17, %v3344_v34 }
 0x34e   : > { %2353 = vtanh.f32 %v1196_v22  ;;  %v2344_v7 = vpop.eup %2343  ;;  %1487 = vmatpush.msra.mxu0 %v2342_v30 }
 0x34f   : > { %2355 = vtanh.f32 %v1237_v55  ;;  %v2346_v62 = vpop.eup %2345  ;;  %1507 = vmatpush.msra.mxu1 %v2344_v7 }
 0x350   : > { %2357 = vtanh.f32 %v1193_v48  ;;  %v2348_v47 = vpop.eup %2347  ;;  %1488 = vmatpush.msra.mxu0 %v2346_v62  ;;  %v1260_v48 = vadd.f32 %v3395_v9, %v3344_v34 }
 0x351   : > { %2359 = vtanh.f32 %v1234_v21  ;;  %v3411_v12 = vpop.f32.mrf.mxu2  ;;  %v3413_v19 = vpop.f32.mrf.mxu3  ;;  %1508 = vmatpush.msra.mxu1 %v2348_v47 }
 0x352   : > { %v2350_v26 = vpop.eup %2349  ;;  %2361 = vtanh.f32 %v1190_v36  ;;  %v3417_v37 = vpop.f32.mrf.mxu0  ;;  %1489 = vmatpush.msra.mxu0 %v2334_v16 }
 0x353   : > { %v3419_v50 = vpop.f32.mrf.mxu1  ;;  %v2352_v49 = vpop.eup %2351  ;;  %2363 = vtanh.f32 %v1231_v29  ;;  %1526 = vmatpush.msra.mxu2 %v2350_v26  ;;  %1509 = vmatpush.msra.mxu1 %v2336_v3  ;;  %v1263_v36 = vadd.f32 %v3417_v37, %v3342_v58 }
 0x354   : > { %v2354_v25 = vpop.eup %2353  ;;  %2365 = vtanh.f32 %v1187_v31  ;;  %1546 = vmatpush.msra.mxu3 %v2352_v49  ;;  %1490 = vmatpush.msra.mxu0 %v2330_v24  ;;  %v1304_v62 = vadd.f32 %v3419_v50, %v3342_v58 }
 0x355   : > { %v2356_v10 = vpop.eup %2355  ;;  %2367 = vtanh.f32 %v1228_v5  ;;  %1527 = vmatpush.msra.mxu2 %v2354_v25  ;;  %1510 = vmatpush.msra.mxu1 %v2332_v56 }
 0x356   : > { %v2358_v59 = vpop.eup %2357  ;;  %2369 = vtanh.f32 %v1184_v0  ;;  %1547 = vmatpush.msra.mxu3 %v2356_v10  ;;  %1491 = vmatpush.msra.mxu0 %v3386_v39 }
 0x357   : > { %v2360_v4 = vpop.eup %2359  ;;  %2371 = vtanh.f32 %v1225_v43  ;;  %1528 = vmatpush.msra.mxu2 %v2358_v59  ;;  %1511 = vmatpush.msra.mxu1 %v3389_v38 }
 0x358   : > { %v2362_v32 = vpop.eup %2361  ;;  %2373 = vtanh.f32 %v1181_v46  ;;  %1548 = vmatpush.msra.mxu3 %v2360_v4  ;;  %1492 = vmatpush.msra.mxu0 %v3378_v57 }
 0x359   : > { %v2364_v51 = vpop.eup %2363  ;;  %2375 = vtanh.f32 %v1222_v15  ;;  %v3433_v60 = vpop.f32.mrf.mxu2  ;;  %1529 = vmatpush.msra.mxu2 %v2362_v32  ;;  %1512 = vmatpush.msra.mxu1 %v3381_v61 }
 0x35a   : > { %v3435_v20 = vpop.f32.mrf.mxu3  ;;  %v2366_v2 = vpop.eup %2365  ;;  %2377 = vtanh.f32 %v1178_v18  ;;  %1549 = vmatpush.msra.mxu3 %v2364_v51  ;;  %1493 = vmatpush.msra.mxu0 %v3370_v8 }
 0x35b   : > { %v1265_v40 = vpop.f32.mrf.mxu0  ;;  %v1306_v45 = vpop.f32.mrf.mxu1  ;;  %2379 = vtanh.f32 %v1219_v52  ;;  %1530 = vmatpush.msra.mxu2 %v2366_v2  ;;  %1513 = vmatpush.msra.mxu1 %v3372_v6 }
 0x35c   : > { %v2368_v39 = vpop.eup %2367  ;;  %2152 = vmatmul.msk.f32.vlgmr.msra.gmra.mxu0 %vm1053_vm0, %v3442_v33  ;;  %2153 = vmatmul.msk.f32.vlgmr.msra.gmra.mxu1 %vm1053_vm0, %v3442_v33  ;;  %2381 = vtanh.f32 %v1260_v48  ;;  %v1266_v31 = vadd.f32 %v1265_v40, %v3359_v1  ;;  %v1307_v47 = vadd.f32 %v1306_v45, %v3359_v1 }
 0x35d   : > { %v2370_v11 = vpop.eup %2369  ;;  %1550 = vmatpush.msra.mxu3 %v2368_v39  ;;  %2383 = vtanh.f32 %v1301_v14 }
 0x35e   : > { %v2372_v57 = vpop.eup %2371  ;;  %1531 = vmatpush.msra.mxu2 %v2370_v11  ;;  %2385 = vtanh.f32 %v1263_v36 }
 0x35f   : > { %v2374_v61 = vpop.eup %2373  ;;  %1551 = vmatpush.msra.mxu3 %v2372_v57  ;;  %2387 = vtanh.f32 %v1304_v62 }
 0x360   : > { %v2376_v38 = vpop.eup %2375  ;;  %1532 = vmatpush.msra.mxu2 %v2374_v61  ;;  %2389 = vtanh.f32 %v1266_v31 }
 0x361   : > { %v2378_v13 = vpop.eup %2377  ;;  %1552 = vmatpush.msra.mxu3 %v2376_v38  ;;  %v3450_v24 = vpop.f32.mrf.mxu2  ;;  %2391 = vtanh.f32 %v1307_v47 }
 0x362   : > { %v2380_v8 = vpop.eup %2379  ;;  %v3452_v56 = vpop.f32.mrf.mxu3  ;;  %1533 = vmatpush.msra.mxu2 %v2378_v13  ;;  %v1348_v36 = vadd.f32 %v3450_v24, %v3359_v1  ;;  %v1386_v24 = vadd.f32 %v3435_v20, %v3342_v58 }
 0x363   : > { %1553 = vmatpush.msra.mxu3 %v2380_v8  ;;  %v1268_v6 = vpop.f32.mrf.mxu0  ;;  %v1309_v53 = vpop.f32.mrf.mxu1  ;;  %2154 = vmatmul.msk.f32.vlgmr.msra.gmra.mxu2 %vm1053_vm0, %v3442_v33 }
 0x364   : > { %2155 = vmatmul.msk.f32.vlgmr.msra.gmra.mxu3 %vm1053_vm0, %v3442_v33  ;;  %v1269_v9 = vadd.f32 %v1268_v6, %v3352_v54  ;;  %v1310_v17 = vadd.f32 %v1309_v53, %v3352_v54  ;;  %v3480_v50 = vpop.eup %2381 }
 0x365   : > { %v3482_v25 = vpop.eup %2383 }
 0x366   : > { %2393 = vtanh.f32 %v1269_v9  ;;  %v3486_v15 = vpop.eup %2385 }
 0x367   : > { %2395 = vtanh.f32 %v1310_v17  ;;  %v3489_v18 = vpop.eup %2387  ;;  %v3538_v17 = vpop.permute.xlu2 %1472 }
 0x368   : > { %v3492_v52 = vpop.eup %2389 }
 0x369   : > { %v3458_v63 = vpop.f32.mrf.mxu2  ;;  %v3495_v51 = vpop.eup %2391 }
 0x36a   : > { %v3460_v16 = vpop.f32.mrf.mxu3 }
 0x36b   : > { %v1271_v22 = vpop.f32.mrf.mxu0  ;;  %v1312_v27 = vpop.f32.mrf.mxu1 }
 0x36c   : > { %v1272_v5 = vadd.f32 %v1271_v22, %v3350_v44  ;;  %v1313_v26 = vadd.f32 %v1312_v27, %v3350_v44  ;;  %v2394_v40 = vpop.eup %2393 }
 0x36d   : > { %v2396_v45 = vpop.eup %2395 }
 0x36e   : > { %2397 = vtanh.f32 %v1272_v5 }
 0x36f   : > { %2399 = vtanh.f32 %v1313_v26 }
 0x371   : > { %v3462_v42 = vpop.f32.mrf.mxu2 }
 0x372   : > { %v3464_v3 = vpop.f32.mrf.mxu3  ;;  %v1354_v48 = vadd.f32 %v3462_v42, %v3350_v44 }
 0x373   : > { %v1274_v55 = vpop.f32.mrf.mxu0  ;;  %v1315_v28 = vpop.f32.mrf.mxu1  ;;  %v1395_v14 = vadd.f32 %v3464_v3, %v3350_v44  ;;  %v1389_v3 = vadd.f32 %v3452_v56, %v3359_v1  ;;  %v1342_v1 = vadd.f32 %v3411_v12, %v3344_v34 }
 0x374   : > { %v1275_v32 = vadd.f32 %v1274_v55, %v3383_v41  ;;  %v1316_v2 = vadd.f32 %v1315_v28, %v3383_v41  ;;  %v2398_v57 = vpop.eup %2397 }
 0x375   : > { %v2400_v8 = vpop.eup %2399 }
 0x379   : > { %v1356_v21 = vpop.f32.mrf.mxu2 }
 0x37a   : > { %v1397_v30 = vpop.f32.mrf.mxu3  ;;  %v1357_v22 = vadd.f32 %v1356_v21, %v3383_v41  ;;  %v1351_v21 = vadd.f32 %v3458_v63, %v3352_v54 }
 0x37b   : > { %v1277_v7 = vpop.f32.mrf.mxu0  ;;  %v1318_v29 = vpop.f32.mrf.mxu1  ;;  %v1398_v55 = vadd.f32 %v1397_v30, %v3383_v41  ;;  %v1392_v30 = vadd.f32 %v3460_v16, %v3352_v54 }
 0x37c   : > { %v1278_v59 = vadd.f32 %v1277_v7, %v3374_v23  ;;  %v1319_v4 = vadd.f32 %v1318_v29, %v3374_v23  ;;  %v1345_v7 = vadd.f32 %v3433_v60, %v3342_v58  ;;  %v1383_v60 = vadd.f32 %v3413_v19, %v3344_v34 }
 0x381   : > { %v1359_v0 = vpop.f32.mrf.mxu2 }
 0x382   : > { %v1400_v37 = vpop.f32.mrf.mxu3  ;;  %v1360_v61 = vadd.f32 %v1359_v0, %v3374_v23 }
 0x383   : > { %v1280_v49 = vpop.f32.mrf.mxu0  ;;  %v1321_v43 = vpop.f32.mrf.mxu1  ;;  %v1401_v6 = vadd.f32 %v1400_v37, %v3374_v23 }
 0x384   : > { %v1281_v46 = vadd.f32 %v1280_v49, %v3366_v35  ;;  %v1322_v10 = vadd.f32 %v1321_v43, %v3366_v35 }
 0x386   : > { %2401 = vtanh.f32 %v1281_v46 }
 0x387   : > { %2403 = vtanh.f32 %v1322_v10 }
 0x388   : > { %2405 = vtanh.f32 %v1278_v59 }
 0x389   : > { %2407 = vtanh.f32 %v1319_v4  ;;  %v1362_v39 = vpop.f32.mrf.mxu2 }
 0x38a   : > { %v1403_v11 = vpop.f32.mrf.mxu3  ;;  %2409 = vtanh.f32 %v1275_v32  ;;  %v1363_v38 = vadd.f32 %v1362_v39, %v3366_v35 }
 0x38b   : > { %v1404_v13 = vadd.f32 %v1403_v11, %v3366_v35  ;;  %2411 = vtanh.f32 %v1316_v2 }
 0x38c   : > { %v2402_v53 = vpop.eup %2401  ;;  %2413 = vtanh.f32 %v1363_v38 }
 0x38d   : > { %v2404_v27 = vpop.eup %2403  ;;  %2415 = vtanh.f32 %v1404_v13  ;;  %1566 = vmatpush.msrb.mxu0 %v2402_v53 }
 0x38e   : > { %v2406_v28 = vpop.eup %2405  ;;  %2417 = vtanh.f32 %v1360_v61  ;;  %1586 = vmatpush.msrb.mxu1 %v2404_v27 }
 0x38f   : > { %v2408_v35 = vpop.eup %2407  ;;  %2419 = vtanh.f32 %v1401_v6  ;;  %1567 = vmatpush.msrb.mxu0 %v2406_v28 }
 0x390   : > { %v2410_v23 = vpop.eup %2409  ;;  %2421 = vtanh.f32 %v1357_v22  ;;  %1587 = vmatpush.msrb.mxu1 %v2408_v35 }
 0x391   : > { %v2412_v41 = vpop.eup %2411  ;;  %2423 = vtanh.f32 %v1398_v55  ;;  %1568 = vmatpush.msrb.mxu0 %v2410_v23 }
 0x392   : > { %v2414_v42 = vpop.eup %2413  ;;  %2425 = vtanh.f32 %v1354_v48  ;;  %1588 = vmatpush.msrb.mxu1 %v2412_v41 }
 0x393   : > { %v2416_v44 = vpop.eup %2415  ;;  %2427 = vtanh.f32 %v1395_v14  ;;  %1569 = vmatpush.msrb.mxu0 %v2398_v57  ;;  %1606 = vmatpush.msrb.mxu2 %v2414_v42 }
 0x394   : > { %v2418_v63 = vpop.eup %2417  ;;  %2429 = vtanh.f32 %v1351_v21  ;;  %1589 = vmatpush.msrb.mxu1 %v2400_v8  ;;  %1626 = vmatpush.msrb.mxu3 %v2416_v44 }
 0x395   : > { %v2420_v54 = vpop.eup %2419  ;;  %2431 = vtanh.f32 %v1392_v30  ;;  %1570 = vmatpush.msrb.mxu0 %v2394_v40  ;;  %1607 = vmatpush.msrb.mxu2 %v2418_v63 }
 0x396   : > { %v2422_v16 = vpop.eup %2421  ;;  %2433 = vtanh.f32 %v1348_v36  ;;  %1590 = vmatpush.msrb.mxu1 %v2396_v45  ;;  %1627 = vmatpush.msrb.mxu3 %v2420_v54 }
 0x397   : > { %v2424_v56 = vpop.eup %2423  ;;  %2435 = vtanh.f32 %v1389_v3  ;;  %1571 = vmatpush.msrb.mxu0 %v3492_v52  ;;  %1608 = vmatpush.msrb.mxu2 %v2422_v16 }
 0x398   : > { %v2426_v29 = vpop.eup %2425  ;;  %2437 = vtanh.f32 %v1345_v7  ;;  %1591 = vmatpush.msrb.mxu1 %v3495_v51  ;;  %1628 = vmatpush.msrb.mxu3 %v2424_v56 }
 0x399   : > { %v2428_v58 = vpop.eup %2427  ;;  %2439 = vtanh.f32 %v1386_v24  ;;  %1572 = vmatpush.msrb.mxu0 %v3486_v15  ;;  %1609 = vmatpush.msrb.mxu2 %v2426_v29 }
 0x39a   : > { %v2430_v12 = vpop.eup %2429  ;;  %2441 = vtanh.f32 %v1342_v1  ;;  %1592 = vmatpush.msrb.mxu1 %v3489_v18  ;;  %1629 = vmatpush.msrb.mxu3 %v2428_v58 }
 0x39b   : > { %v2432_v34 = vpop.eup %2431  ;;  %2443 = vtanh.f32 %v1383_v60  ;;  %1573 = vmatpush.msrb.mxu0 %v3480_v50  ;;  %1610 = vmatpush.msrb.mxu2 %v2430_v12 }
 0x39c   : > { %v2434_v19 = vpop.eup %2433  ;;  %1593 = vmatpush.msrb.mxu1 %v3482_v25  ;;  %1630 = vmatpush.msrb.mxu3 %v2432_v34 }
 0x39d   : > { %v2436_v20 = vpop.eup %2435  ;;  %2156 = vmatmul.msk.f32.vlgmr.msrb.gmra.mxu0 %vm1053_vm0, %v3442_v33  ;;  %2157 = vmatmul.msk.f32.vlgmr.msrb.gmra.mxu1 %vm1053_vm0, %v3442_v33 }
 0x39e   : > { %v2438_v62 = vpop.eup %2437  ;;  %1611 = vmatpush.msrb.mxu2 %v2434_v19  ;;  %1631 = vmatpush.msrb.mxu3 %v2436_v20 }
 0x39f   : > { %v2440_v31 = vpop.eup %2439 }
 0x3a0   : > { %v2442_v47 = vpop.eup %2441  ;;  %1612 = vmatpush.msrb.mxu2 %v2438_v62  ;;  %1632 = vmatpush.msrb.mxu3 %v2440_v31 }
 0x3a1   : > { %v2444_v9 = vpop.eup %2443 }
 0x3a2   : > { %1613 = vmatpush.msrb.mxu2 %v2442_v47  ;;  %1633 = vmatpush.msrb.mxu3 %v2444_v9 }
 0x3a3   : > { %2158 = vmatmul.msk.f32.vlgmr.msrb.gmra.mxu2 %vm1053_vm0, %v3442_v33  ;;  %2159 = vmatmul.msk.f32.vlgmr.msrb.gmra.mxu3 %vm1053_vm0, %v3442_v33 }
 0x3d9   : > { %v1495_v5 = vpop.f32.mrf.mxu0  ;;  %v1515_v26 = vpop.f32.mrf.mxu1 }
 0x3da   : > { %v1496_v0 = vadd.f32 %v1495_v5, %v3538_v17  ;;  %v1516_v37 = vadd.f32 %v1515_v26, %v3538_v17 }
 0x3dc   : > { %1670 = vxpose.xlu0.b32.start.end [1/1] (short) %v1516_v37, 128  ;;  %1638 = vxpose.xlu1.b32.start.end [1/1] (short) %v1496_v0, 128 }
 0x3e6   : > { %v1535_v50 = vpop.f32.mrf.mxu2 }
 0x3e7   : > { %v1536_v49 = vadd.f32 %v1535_v50, %v3538_v17  ;;  %v1555_v43 = vpop.f32.mrf.mxu3 }
 0x3e8   : > { %v1556_v46 = vadd.f32 %v1555_v43, %v3538_v17 }
 0x3e9   : > { %1702 = vxpose.xlu2.b32.start.end [1/1] (short) %v1536_v49, 128 }
 0x41a   : > { %v1595_v25 = vpop.f32.mrf.mxu1  ;;  %v1575_v10 = vpop.f32.mrf.mxu0 }
 0x41b   : > { %v1596_v33 = vadd.f32 %v1595_v25, %v3538_v17  ;;  %v1576_v15 = vadd.f32 %v1575_v10, %v3538_v17 }
 0x426   : > { %v1615_v48 = vpop.f32.mrf.mxu2  ;;  %v1635_v21 = vpop.f32.mrf.mxu3 }
 0x427   : > { %v1616_v35 = vadd.f32 %v1615_v48, %v3538_v17  ;;  %v1636_v42 = vadd.f32 %v1635_v21, %v3538_v17 }
 0x45c   : > { %1734 = vxpose.xlu0.b32.start.end [1/1] (short) %v1556_v46, 128  ;;  %1798 = vxpose.xlu1.b32.start.end [1/1] (short) %v1596_v33, 128 }
 0x469   : > { %1766 = vxpose.xlu2.b32.start.end [1/1] (short) %v1576_v15, 128 }
 0x480   : > { %v1686_v59 = vpop.trf.xlu0  ;;  %v1654_v36 = vpop.trf.xlu1 }
 0x481   : > { %1911 = vst.msk [vmem:[%s3551_s8 + $0x80] sm:$0xff] %vm1894_vm1, %v1686_v59 }
 0x482   : > { %v1718_v18 = vpop.trf.xlu2  ;;  %1895 = vst.msk [vmem:[%s3551_s8] sm:$0xff] %vm1894_vm1, %v1654_v36 }
 0x483   : > { %1927 = vst.msk [vmem:[%s3551_s8 + $0x100] sm:$0xff] %vm1894_vm1, %v1718_v18 }
 0x488   : > { %v1687_v4 = vpop.trf.xlu0  ;;  %v1655_v63 = vpop.trf.xlu1 }
 0x489   : > { %1912 = vst.msk [vmem:[%s3551_s8 + $0x88] sm:$0xff] %vm1894_vm1, %v1687_v4 }
 0x48a   : > { %v1719_v52 = vpop.trf.xlu2  ;;  %1896 = vst.msk [vmem:[%s3551_s8 + $0x8] sm:$0xff] %vm1894_vm1, %v1655_v63 }
 0x48b   : > { %1928 = vst.msk [vmem:[%s3551_s8 + $0x108] sm:$0xff] %vm1894_vm1, %v1719_v52 }
 0x490   : > { %v1688_v32 = vpop.trf.xlu0  ;;  %v1656_v24 = vpop.trf.xlu1 }
 0x491   : > { %1913 = vst.msk [vmem:[%s3551_s8 + $0x90] sm:$0xff] %vm1894_vm1, %v1688_v32 }
 0x492   : > { %v1720_v51 = vpop.trf.xlu2  ;;  %1897 = vst.msk [vmem:[%s3551_s8 + $0x10] sm:$0xff] %vm1894_vm1, %v1656_v24 }
 0x493   : > { %1929 = vst.msk [vmem:[%s3551_s8 + $0x110] sm:$0xff] %vm1894_vm1, %v1720_v51 }
 0x498   : > { %v1689_v2 = vpop.trf.xlu0  ;;  %v1657_v56 = vpop.trf.xlu1 }
 0x499   : > { %1914 = vst.msk [vmem:[%s3551_s8 + $0x98] sm:$0xff] %vm1894_vm1, %v1689_v2 }
 0x49a   : > { %v1721_v40 = vpop.trf.xlu2  ;;  %1898 = vst.msk [vmem:[%s3551_s8 + $0x18] sm:$0xff] %vm1894_vm1, %v1657_v56 }
 0x49b   : > { %1930 = vst.msk [vmem:[%s3551_s8 + $0x118] sm:$0xff] %vm1894_vm1, %v1721_v40 }
 0x4a0   : > { %v1690_v45 = vpop.trf.xlu0  ;;  %v1658_v58 = vpop.trf.xlu1 }
 0x4a1   : > { %1915 = vst.msk [vmem:[%s3551_s8 + $0xa0] sm:$0xff] %vm1894_vm1, %v1690_v45 }
 0x4a2   : > { %v1722_v39 = vpop.trf.xlu2  ;;  %1899 = vst.msk [vmem:[%s3551_s8 + $0x20] sm:$0xff] %vm1894_vm1, %v1658_v58 }
 0x4a3   : > { %1931 = vst.msk [vmem:[%s3551_s8 + $0x120] sm:$0xff] %vm1894_vm1, %v1722_v39 }
 0x4a8   : > { %v1691_v11 = vpop.trf.xlu0  ;;  %v1659_v19 = vpop.trf.xlu1 }
 0x4a9   : > { %1916 = vst.msk [vmem:[%s3551_s8 + $0xa8] sm:$0xff] %vm1894_vm1, %v1691_v11 }
 0x4aa   : > { %v1723_v57 = vpop.trf.xlu2  ;;  %1900 = vst.msk [vmem:[%s3551_s8 + $0x28] sm:$0xff] %vm1894_vm1, %v1659_v19 }
 0x4ab   : > { %1932 = vst.msk [vmem:[%s3551_s8 + $0x128] sm:$0xff] %vm1894_vm1, %v1723_v57 }
 0x4b0   : > { %v1692_v38 = vpop.trf.xlu0  ;;  %v1660_v31 = vpop.trf.xlu1 }
 0x4b1   : > { %1917 = vst.msk [vmem:[%s3551_s8 + $0xb0] sm:$0xff] %vm1894_vm1, %v1692_v38 }
 0x4b2   : > { %v1724_v61 = vpop.trf.xlu2  ;;  %1901 = vst.msk [vmem:[%s3551_s8 + $0x30] sm:$0xff] %vm1894_vm1, %v1660_v31 }
 0x4b3   : > { %1933 = vst.msk [vmem:[%s3551_s8 + $0x130] sm:$0xff] %vm1894_vm1, %v1724_v61 }
 0x4b8   : > { %v1693_v8 = vpop.trf.xlu0  ;;  %v1661_v17 = vpop.trf.xlu1 }
 0x4b9   : > { %1918 = vst.msk [vmem:[%s3551_s8 + $0xb8] sm:$0xff] %vm1894_vm1, %v1693_v8 }
 0x4ba   : > { %v1725_v13 = vpop.trf.xlu2  ;;  %1902 = vst.msk [vmem:[%s3551_s8 + $0x38] sm:$0xff] %vm1894_vm1, %v1661_v17 }
 0x4bb   : > { %1934 = vst.msk [vmem:[%s3551_s8 + $0x138] sm:$0xff] %vm1894_vm1, %v1725_v13 }
 0x4c0   : > { %v1694_v53 = vpop.trf.xlu0  ;;  %v1662_v0 = vpop.trf.xlu1 }
 0x4c1   : > { %1919 = vst.msk [vmem:[%s3551_s8 + $0xc0] sm:$0xff] %vm1894_vm1, %v1694_v53 }
 0x4c2   : > { %v1726_v6 = vpop.trf.xlu2  ;;  %1903 = vst.msk [vmem:[%s3551_s8 + $0x40] sm:$0xff] %vm1894_vm1, %v1662_v0 }
 0x4c3   : > { %1935 = vst.msk [vmem:[%s3551_s8 + $0x140] sm:$0xff] %vm1894_vm1, %v1726_v6 }
 0x4c8   : > { %v1695_v27 = vpop.trf.xlu0  ;;  %v1663_v49 = vpop.trf.xlu1 }
 0x4c9   : > { %1920 = vst.msk [vmem:[%s3551_s8 + $0xc8] sm:$0xff] %vm1894_vm1, %v1695_v27 }
 0x4ca   : > { %v1727_v22 = vpop.trf.xlu2  ;;  %1904 = vst.msk [vmem:[%s3551_s8 + $0x48] sm:$0xff] %vm1894_vm1, %v1663_v49 }
 0x4cb   : > { %1936 = vst.msk [vmem:[%s3551_s8 + $0x148] sm:$0xff] %vm1894_vm1, %v1727_v22 }
 0x4d0   : > { %v1696_v28 = vpop.trf.xlu0  ;;  %v1664_v46 = vpop.trf.xlu1 }
 0x4d1   : > { %1921 = vst.msk [vmem:[%s3551_s8 + $0xd0] sm:$0xff] %vm1894_vm1, %v1696_v28 }
 0x4d2   : > { %v1728_v55 = vpop.trf.xlu2  ;;  %1905 = vst.msk [vmem:[%s3551_s8 + $0x50] sm:$0xff] %vm1894_vm1, %v1664_v46 }
 0x4d3   : > { %1937 = vst.msk [vmem:[%s3551_s8 + $0x150] sm:$0xff] %vm1894_vm1, %v1728_v55 }
 0x4d8   : > { %v1697_v23 = vpop.trf.xlu0  ;;  %v1665_v15 = vpop.trf.xlu1 }
 0x4d9   : > { %1922 = vst.msk [vmem:[%s3551_s8 + $0xd8] sm:$0xff] %vm1894_vm1, %v1697_v23 }
 0x4da   : > { %v1729_v14 = vpop.trf.xlu2  ;;  %1906 = vst.msk [vmem:[%s3551_s8 + $0x58] sm:$0xff] %vm1894_vm1, %v1665_v15 }
 0x4db   : > { %1938 = vst.msk [vmem:[%s3551_s8 + $0x158] sm:$0xff] %vm1894_vm1, %v1729_v14 }
 0x4dc   : > { %1830 = vxpose.xlu0.b32.start.end [1/1] (short) %v1616_v35, 128 }
 0x4e0   : > { %v1698_v30 = vpop.trf.xlu0  ;;  %v1666_v4 = vpop.trf.xlu1 }
 0x4e1   : > { %1923 = vst.msk [vmem:[%s3551_s8 + $0xe0] sm:$0xff] %vm1894_vm1, %v1698_v30 }
 0x4e2   : > { %v1730_v41 = vpop.trf.xlu2  ;;  %1907 = vst.msk [vmem:[%s3551_s8 + $0x60] sm:$0xff] %vm1894_vm1, %v1666_v4 }
 0x4e3   : > { %1939 = vst.msk [vmem:[%s3551_s8 + $0x160] sm:$0xff] %vm1894_vm1, %v1730_v41 }
 0x4e8   : > { %v1699_v3 = vpop.trf.xlu0  ;;  %v1667_v51 = vpop.trf.xlu1 }
 0x4e9   : > { %1862 = vxpose.xlu2.b32.start.end [1/1] (short) %v1636_v42, 128  ;;  %1924 = vst.msk [vmem:[%s3551_s8 + $0xe8] sm:$0xff] %vm1894_vm1, %v1699_v3 }
 0x4ea   : > { %v1731_v44 = vpop.trf.xlu2  ;;  %1908 = vst.msk [vmem:[%s3551_s8 + $0x68] sm:$0xff] %vm1894_vm1, %v1667_v51 }
 0x4eb   : > { %1940 = vst.msk [vmem:[%s3551_s8 + $0x168] sm:$0xff] %vm1894_vm1, %v1731_v44 }
 0x4f0   : > { %v1700_v54 = vpop.trf.xlu0  ;;  %v1668_v45 = vpop.trf.xlu1 }
 0x4f1   : > { %1925 = vst.msk [vmem:[%s3551_s8 + $0xf0] sm:$0xff] %vm1894_vm1, %v1700_v54 }
 0x4f2   : > { %v1732_v7 = vpop.trf.xlu2  ;;  %1909 = vst.msk [vmem:[%s3551_s8 + $0x70] sm:$0xff] %vm1894_vm1, %v1668_v45 }
 0x4f3   : > { %1941 = vst.msk [vmem:[%s3551_s8 + $0x170] sm:$0xff] %vm1894_vm1, %v1732_v7 }
 0x4f8   : > { %v1701_v1 = vpop.trf.xlu0  ;;  %v1669_v57 = vpop.trf.xlu1 }
 0x4f9   : > { %1926 = vst.msk [vmem:[%s3551_s8 + $0xf8] sm:$0xff] %vm1894_vm1, %v1701_v1 }
 0x4fa   : > { %v1733_v16 = vpop.trf.xlu2  ;;  %1910 = vst.msk [vmem:[%s3551_s8 + $0x78] sm:$0xff] %vm1894_vm1, %v1669_v57 }
 0x4fb   : > { %1942 = vst.msk [vmem:[%s3551_s8 + $0x178] sm:$0xff] %vm1894_vm1, %v1733_v16 }
 0x500   : > { %v1750_v60 = vpop.trf.xlu0  ;;  %v1814_v13 = vpop.trf.xlu1 }
 0x501   : > { %1943 = vst.msk [vmem:[%s3551_s8 + $0x180] sm:$0xff] %vm1894_vm1, %v1750_v60 }
 0x502   : > { %v1782_v29 = vpop.trf.xlu2  ;;  %1975 = vst.msk [vmem:[%s3551_s8 + $0x280] sm:$0xff] %vm1894_vm1, %v1814_v13 }
 0x503   : > { %1959 = vst.msk [vmem:[%s3551_s8 + $0x200] sm:$0xff] %vm1894_vm1, %v1782_v29 }
 0x508   : > { %v1751_v12 = vpop.trf.xlu0  ;;  %v1815_v53 = vpop.trf.xlu1 }
 0x509   : > { %1944 = vst.msk [vmem:[%s3551_s8 + $0x188] sm:$0xff] %vm1894_vm1, %v1751_v12 }
 0x50a   : > { %v1783_v34 = vpop.trf.xlu2  ;;  %1976 = vst.msk [vmem:[%s3551_s8 + $0x288] sm:$0xff] %vm1894_vm1, %v1815_v53 }
 0x50b   : > { %1960 = vst.msk [vmem:[%s3551_s8 + $0x208] sm:$0xff] %vm1894_vm1, %v1783_v34 }
 0x510   : > { %v1752_v20 = vpop.trf.xlu0  ;;  %v1816_v55 = vpop.trf.xlu1 }
 0x511   : > { %1945 = vst.msk [vmem:[%s3551_s8 + $0x190] sm:$0xff] %vm1894_vm1, %v1752_v20 }
 0x512   : > { %v1784_v62 = vpop.trf.xlu2  ;;  %1977 = vst.msk [vmem:[%s3551_s8 + $0x290] sm:$0xff] %vm1894_vm1, %v1816_v55 }
 0x513   : > { %1961 = vst.msk [vmem:[%s3551_s8 + $0x210] sm:$0xff] %vm1894_vm1, %v1784_v62 }
 0x518   : > { %v1753_v47 = vpop.trf.xlu0  ;;  %v1817_v35 = vpop.trf.xlu1 }
 0x519   : > { %1946 = vst.msk [vmem:[%s3551_s8 + $0x198] sm:$0xff] %vm1894_vm1, %v1753_v47 }
 0x51a   : > { %v1785_v9 = vpop.trf.xlu2  ;;  %1978 = vst.msk [vmem:[%s3551_s8 + $0x298] sm:$0xff] %vm1894_vm1, %v1817_v35 }
 0x51b   : > { %1962 = vst.msk [vmem:[%s3551_s8 + $0x218] sm:$0xff] %vm1894_vm1, %v1785_v9 }
 0x520   : > { %v1754_v5 = vpop.trf.xlu0  ;;  %v1818_v21 = vpop.trf.xlu1 }
 0x521   : > { %1947 = vst.msk [vmem:[%s3551_s8 + $0x1a0] sm:$0xff] %vm1894_vm1, %v1754_v5 }
 0x522   : > { %v1786_v26 = vpop.trf.xlu2  ;;  %1979 = vst.msk [vmem:[%s3551_s8 + $0x2a0] sm:$0xff] %vm1894_vm1, %v1818_v21 }
 0x523   : > { %1963 = vst.msk [vmem:[%s3551_s8 + $0x220] sm:$0xff] %vm1894_vm1, %v1786_v26 }
 0x528   : > { %v1755_v37 = vpop.trf.xlu0  ;;  %v1819_v42 = vpop.trf.xlu1 }
 0x529   : > { %1948 = vst.msk [vmem:[%s3551_s8 + $0x1a8] sm:$0xff] %vm1894_vm1, %v1755_v37 }
 0x52a   : > { %v1787_v50 = vpop.trf.xlu2  ;;  %1980 = vst.msk [vmem:[%s3551_s8 + $0x2a8] sm:$0xff] %vm1894_vm1, %v1819_v42 }
 0x52b   : > { %1964 = vst.msk [vmem:[%s3551_s8 + $0x228] sm:$0xff] %vm1894_vm1, %v1787_v50 }
 0x530   : > { %v1756_v43 = vpop.trf.xlu0  ;;  %v1820_v3 = vpop.trf.xlu1 }
 0x531   : > { %1949 = vst.msk [vmem:[%s3551_s8 + $0x1b0] sm:$0xff] %vm1894_vm1, %v1756_v43 }
 0x532   : > { %v1788_v25 = vpop.trf.xlu2  ;;  %1981 = vst.msk [vmem:[%s3551_s8 + $0x2b0] sm:$0xff] %vm1894_vm1, %v1820_v3 }
 0x533   : > { %1965 = vst.msk [vmem:[%s3551_s8 + $0x230] sm:$0xff] %vm1894_vm1, %v1788_v25 }
 0x538   : > { %v1757_v33 = vpop.trf.xlu0  ;;  %v1821_v54 = vpop.trf.xlu1 }
 0x539   : > { %1950 = vst.msk [vmem:[%s3551_s8 + $0x1b8] sm:$0xff] %vm1894_vm1, %v1757_v33 }
 0x53a   : > { %v1789_v10 = vpop.trf.xlu2  ;;  %1982 = vst.msk [vmem:[%s3551_s8 + $0x2b8] sm:$0xff] %vm1894_vm1, %v1821_v54 }
 0x53b   : > { %1966 = vst.msk [vmem:[%s3551_s8 + $0x238] sm:$0xff] %vm1894_vm1, %v1789_v10 }
 0x540   : > { %v1758_v59 = vpop.trf.xlu0  ;;  %v1822_v1 = vpop.trf.xlu1 }
 0x541   : > { %1951 = vst.msk [vmem:[%s3551_s8 + $0x1c0] sm:$0xff] %vm1894_vm1, %v1758_v59 }
 0x542   : > { %v1790_v18 = vpop.trf.xlu2  ;;  %1983 = vst.msk [vmem:[%s3551_s8 + $0x2c0] sm:$0xff] %vm1894_vm1, %v1822_v1 }
 0x543   : > { %1967 = vst.msk [vmem:[%s3551_s8 + $0x240] sm:$0xff] %vm1894_vm1, %v1790_v18 }
 0x548   : > { %v1759_v52 = vpop.trf.xlu0  ;;  %v1823_v29 = vpop.trf.xlu1 }
 0x549   : > { %1952 = vst.msk [vmem:[%s3551_s8 + $0x1c8] sm:$0xff] %vm1894_vm1, %v1759_v52 }
 0x54a   : > { %v1791_v32 = vpop.trf.xlu2  ;;  %1984 = vst.msk [vmem:[%s3551_s8 + $0x2c8] sm:$0xff] %vm1894_vm1, %v1823_v29 }
 0x54b   : > { %1968 = vst.msk [vmem:[%s3551_s8 + $0x248] sm:$0xff] %vm1894_vm1, %v1791_v32 }
 0x550   : > { %v1760_v2 = vpop.trf.xlu0  ;;  %v1824_v34 = vpop.trf.xlu1 }
 0x551   : > { %1953 = vst.msk [vmem:[%s3551_s8 + $0x1d0] sm:$0xff] %vm1894_vm1, %v1760_v2 }
 0x552   : > { %v1792_v40 = vpop.trf.xlu2  ;;  %1985 = vst.msk [vmem:[%s3551_s8 + $0x2d0] sm:$0xff] %vm1894_vm1, %v1824_v34 }
 0x553   : > { %1969 = vst.msk [vmem:[%s3551_s8 + $0x250] sm:$0xff] %vm1894_vm1, %v1792_v40 }
 0x558   : > { %v1761_v39 = vpop.trf.xlu0  ;;  %v1825_v62 = vpop.trf.xlu1 }
 0x559   : > { %1954 = vst.msk [vmem:[%s3551_s8 + $0x1d8] sm:$0xff] %vm1894_vm1, %v1761_v39 }
 0x55a   : > { %v1793_v11 = vpop.trf.xlu2  ;;  %1986 = vst.msk [vmem:[%s3551_s8 + $0x2d8] sm:$0xff] %vm1894_vm1, %v1825_v62 }
 0x55b   : > { %1970 = vst.msk [vmem:[%s3551_s8 + $0x258] sm:$0xff] %vm1894_vm1, %v1793_v11 }
 0x560   : > { %v1762_v61 = vpop.trf.xlu0  ;;  %v1826_v9 = vpop.trf.xlu1 }
 0x561   : > { %1955 = vst.msk [vmem:[%s3551_s8 + $0x1e0] sm:$0xff] %vm1894_vm1, %v1762_v61 }
 0x562   : > { %v1794_v38 = vpop.trf.xlu2  ;;  %1987 = vst.msk [vmem:[%s3551_s8 + $0x2e0] sm:$0xff] %vm1894_vm1, %v1826_v9 }
 0x563   : > { %1971 = vst.msk [vmem:[%s3551_s8 + $0x260] sm:$0xff] %vm1894_vm1, %v1794_v38 }
 0x568   : > { %v1763_v8 = vpop.trf.xlu0  ;;  %v1827_v26 = vpop.trf.xlu1 }
 0x569   : > { %1956 = vst.msk [vmem:[%s3551_s8 + $0x1e8] sm:$0xff] %vm1894_vm1, %v1763_v8 }
 0x56a   : > { %v1795_v6 = vpop.trf.xlu2  ;;  %1988 = vst.msk [vmem:[%s3551_s8 + $0x2e8] sm:$0xff] %vm1894_vm1, %v1827_v26 }
 0x56b   : > { %1972 = vst.msk [vmem:[%s3551_s8 + $0x268] sm:$0xff] %vm1894_vm1, %v1795_v6 }
 0x570   : > { %v1764_v22 = vpop.trf.xlu0  ;;  %v1828_v50 = vpop.trf.xlu1 }
 0x571   : > { %1957 = vst.msk [vmem:[%s3551_s8 + $0x1f0] sm:$0xff] %vm1894_vm1, %v1764_v22 }
 0x572   : > { %v1796_v27 = vpop.trf.xlu2  ;;  %1989 = vst.msk [vmem:[%s3551_s8 + $0x2f0] sm:$0xff] %vm1894_vm1, %v1828_v50 }
 0x573   : > { %1973 = vst.msk [vmem:[%s3551_s8 + $0x270] sm:$0xff] %vm1894_vm1, %v1796_v27 }
 0x578   : > { %v1765_v28 = vpop.trf.xlu0  ;;  %v1829_v25 = vpop.trf.xlu1 }
 0x579   : > { %1958 = vst.msk [vmem:[%s3551_s8 + $0x1f8] sm:$0xff] %vm1894_vm1, %v1765_v28 }
 0x57a   : > { %v1797_v48 = vpop.trf.xlu2  ;;  %1990 = vst.msk [vmem:[%s3551_s8 + $0x2f8] sm:$0xff] %vm1894_vm1, %v1829_v25 }
 0x57b   : > { %1974 = vst.msk [vmem:[%s3551_s8 + $0x278] sm:$0xff] %vm1894_vm1, %v1797_v48 }
 0x580   : > { %v1846_v14 = vpop.trf.xlu0 }
 0x581   : > { %1991 = vst.msk [vmem:[%s3551_s8 + $0x300] sm:$0xff] %vm1894_vm1, %v1846_v14 }
 0x582   : > { %v1878_v23 = vpop.trf.xlu2 }
 0x583   : > { %2007 = vst.msk [vmem:[%s3551_s8 + $0x380] sm:$0xff] %vm1894_vm1, %v1878_v23 }
 0x588   : > { %v1847_v41 = vpop.trf.xlu0 }
 0x589   : > { %1992 = vst.msk [vmem:[%s3551_s8 + $0x308] sm:$0xff] %vm1894_vm1, %v1847_v41 }
 0x58a   : > { %v1879_v30 = vpop.trf.xlu2 }
 0x58b   : > { %2008 = vst.msk [vmem:[%s3551_s8 + $0x388] sm:$0xff] %vm1894_vm1, %v1879_v30 }
 0x590   : > { %v1848_v36 = vpop.trf.xlu0 }
 0x591   : > { %1993 = vst.msk [vmem:[%s3551_s8 + $0x310] sm:$0xff] %vm1894_vm1, %v1848_v36 }
 0x592   : > { %v1880_v44 = vpop.trf.xlu2 }
 0x593   : > { %2009 = vst.msk [vmem:[%s3551_s8 + $0x390] sm:$0xff] %vm1894_vm1, %v1880_v44 }
 0x598   : > { %v1849_v63 = vpop.trf.xlu0 }
 0x599   : > { %1994 = vst.msk [vmem:[%s3551_s8 + $0x318] sm:$0xff] %vm1894_vm1, %v1849_v63 }
 0x59a   : > { %v1881_v7 = vpop.trf.xlu2 }
 0x59b   : > { %2010 = vst.msk [vmem:[%s3551_s8 + $0x398] sm:$0xff] %vm1894_vm1, %v1881_v7 }
 0x5a0   : > { %v1850_v24 = vpop.trf.xlu0 }
 0x5a1   : > { %1995 = vst.msk [vmem:[%s3551_s8 + $0x320] sm:$0xff] %vm1894_vm1, %v1850_v24 }
 0x5a2   : > { %v1882_v16 = vpop.trf.xlu2 }
 0x5a3   : > { %2011 = vst.msk [vmem:[%s3551_s8 + $0x3a0] sm:$0xff] %vm1894_vm1, %v1882_v16 }
 0x5a8   : > { %v1851_v56 = vpop.trf.xlu0 }
 0x5a9   : > { %1996 = vst.msk [vmem:[%s3551_s8 + $0x328] sm:$0xff] %vm1894_vm1, %v1851_v56 }
 0x5aa   : > { %v1883_v60 = vpop.trf.xlu2 }
 0x5ab   : > { %2012 = vst.msk [vmem:[%s3551_s8 + $0x3a8] sm:$0xff] %vm1894_vm1, %v1883_v60 }
 0x5b0   : > { %v1852_v58 = vpop.trf.xlu0 }
 0x5b1   : > { %1997 = vst.msk [vmem:[%s3551_s8 + $0x330] sm:$0xff] %vm1894_vm1, %v1852_v58 }
 0x5b2   : > { %v1884_v12 = vpop.trf.xlu2 }
 0x5b3   : > { %2013 = vst.msk [vmem:[%s3551_s8 + $0x3b0] sm:$0xff] %vm1894_vm1, %v1884_v12 }
 0x5b8   : > { %v1853_v19 = vpop.trf.xlu0 }
 0x5b9   : > { %1998 = vst.msk [vmem:[%s3551_s8 + $0x338] sm:$0xff] %vm1894_vm1, %v1853_v19 }
 0x5ba   : > { %v1885_v20 = vpop.trf.xlu2 }
 0x5bb   : > { %2014 = vst.msk [vmem:[%s3551_s8 + $0x3b8] sm:$0xff] %vm1894_vm1, %v1885_v20 }
 0x5c0   : > { %v1854_v31 = vpop.trf.xlu0 }
 0x5c1   : > { %1999 = vst.msk [vmem:[%s3551_s8 + $0x340] sm:$0xff] %vm1894_vm1, %v1854_v31 }
 0x5c2   : > { %v1886_v47 = vpop.trf.xlu2 }
 0x5c3   : > { %2015 = vst.msk [vmem:[%s3551_s8 + $0x3c0] sm:$0xff] %vm1894_vm1, %v1886_v47 }
 0x5c8   : > { %v1855_v17 = vpop.trf.xlu0 }
 0x5c9   : > { %2000 = vst.msk [vmem:[%s3551_s8 + $0x348] sm:$0xff] %vm1894_vm1, %v1855_v17 }
 0x5ca   : > { %v1887_v5 = vpop.trf.xlu2 }
 0x5cb   : > { %2016 = vst.msk [vmem:[%s3551_s8 + $0x3c8] sm:$0xff] %vm1894_vm1, %v1887_v5 }
 0x5d0   : > { %v1856_v0 = vpop.trf.xlu0 }
 0x5d1   : > { %2001 = vst.msk [vmem:[%s3551_s8 + $0x350] sm:$0xff] %vm1894_vm1, %v1856_v0 }
 0x5d2   : > { %v1888_v37 = vpop.trf.xlu2 }
 0x5d3   : > { %2017 = vst.msk [vmem:[%s3551_s8 + $0x3d0] sm:$0xff] %vm1894_vm1, %v1888_v37 }
 0x5d8   : > { %v1857_v49 = vpop.trf.xlu0 }
 0x5d9   : > { %2002 = vst.msk [vmem:[%s3551_s8 + $0x358] sm:$0xff] %vm1894_vm1, %v1857_v49 }
 0x5da   : > { %v1889_v43 = vpop.trf.xlu2 }
 0x5db   : > { %2018 = vst.msk [vmem:[%s3551_s8 + $0x3d8] sm:$0xff] %vm1894_vm1, %v1889_v43 }
 0x5e0   : > { %v1858_v46 = vpop.trf.xlu0 }
 0x5e1   : > { %2003 = vst.msk [vmem:[%s3551_s8 + $0x360] sm:$0xff] %vm1894_vm1, %v1858_v46 }
 0x5e2   : > { %v1890_v33 = vpop.trf.xlu2 }
 0x5e3   : > { %2019 = vst.msk [vmem:[%s3551_s8 + $0x3e0] sm:$0xff] %vm1894_vm1, %v1890_v33 }
 0x5e8   : > { %v1859_v10 = vpop.trf.xlu0 }
 0x5e9   : > { %2004 = vst.msk [vmem:[%s3551_s8 + $0x368] sm:$0xff] %vm1894_vm1, %v1859_v10 }
 0x5ea   : > { %v1891_v15 = vpop.trf.xlu2 }
 0x5eb   : > { %2020 = vst.msk [vmem:[%s3551_s8 + $0x3e8] sm:$0xff] %vm1894_vm1, %v1891_v15 }
 0x5f0   : > { %v1860_v59 = vpop.trf.xlu0 }
 0x5f1   : > { %2005 = vst.msk [vmem:[%s3551_s8 + $0x370] sm:$0xff] %vm1894_vm1, %v1860_v59 }
 0x5f2   : > { %v1892_v18 = vpop.trf.xlu2 }
 0x5f3   : > { %2021 = vst.msk [vmem:[%s3551_s8 + $0x3f0] sm:$0xff] %vm1894_vm1, %v1892_v18 }
 0x5f8   : > { %v1861_v4 = vpop.trf.xlu0 }
 0x5f9   : > { %2006 = vst.msk [vmem:[%s3551_s8 + $0x378] sm:$0xff] %vm1894_vm1, %v1861_v4 }
 0x5fa   : > { %v1893_v52 = vpop.trf.xlu2 }
 0x5fb   : > { %2022 = vst.msk [vmem:[%s3551_s8 + $0x3f8] sm:$0xff] %vm1894_vm1, %v1893_v52 }
 0x5fc PF: > { %s12_s9 = sadd.s32 1, %s2451_s9  }
 0x5fd   : > { %p9_p4 = scmp.ge.s32.totalorder %s12_s9, 4  }
 0x5ff   :  { %11 = sbr.rel (!%p9_p4) target bundleno = 1 (0x1), region = 58 }

</bundles_post_ra>
